<compile_context>
chip_gen: v7x
topology: tpu7x:2x2x1
jax: 0.10.0
libtpu: 0.0.40
codegen_flags: <defaults>
</compile_context>

<pallas_src>
import jax
import jax.numpy as jnp
from jax.experimental import pallas as pl
from jax.experimental.pallas import tpu as pltpu


# ----------------------------- Pallas kernel ------------------------------ #
def deepfm_kernel(fvfw_ref, emb_ref, w1_ref, w2_ref, w3_ref,
                  expand_ref, selblk_ref, bias_ref,
                  wf1_ref, wf2_ref, wf3_ref, out_ref):
    fvfw = fvfw_ref[...]                               # (bt, 2F)  f32 [fv | fw]
    e32 = emb_ref[...].astype(jnp.float32)             # (bt, F*E) bf16 -> f32

    F = fvfw.shape[1] // 2
    E = selblk_ref.shape[1] // 2
    H1 = w1_ref.shape[1]
    H2 = w2_ref.shape[1]
    H3 = w3_ref.shape[1]

    # Packed small constants: rows = [b1, b2, b3, bf]  (BN already folded).
    bias = bias_ref[...]                                # (4, P)
    b1 = bias[0:1, :H1]
    b2 = bias[1:2, :H2]
    b3 = bias[2:3, :H3]
    bf = bias[3:4, 0:1]

    # Broadcast feat_value to the flat (F*E) embedding layout on the MXU:
    # expand_ref is (2F, F*E) with a 0/1 pattern on the fv half and zeros on
    # the fw half, so the packed input can be used directly.
    fv_exp = jnp.dot(fvfw, expand_ref[...],
                     preferred_element_type=jnp.float32)          # (bt, F*E)
    fev = e32 * fv_exp                                            # (bt, F*E)

    # ---- first order: sum_f fv*fw*wf1 goes straight into the final fc ----
    fv = fvfw[:, :F]
    fw = fvfw[:, F:]
    first_prod = fv * fw                                # == y_first_order
    # TODO(synk): nn.Dropout(dropout_fm[0]) treated as identity (eval mode).
    out1 = jnp.dot(first_prod, wf1_ref[...],
                   preferred_element_type=jnp.float32)            # (bt, 1)

    # ---- second order (FM): one fused MXU reduction gives per-embedding-dim
    #      [sum(fev), sum(fev^2)] via a block-diagonal 0/1 select matrix ----
    cat = jnp.concatenate([fev, fev * fev], axis=1)               # (bt, 2*F*E)
    both = jnp.dot(cat, selblk_ref[...],
                   preferred_element_type=jnp.float32)            # (bt, 2E)
    summed = both[:, :E]
    part2 = both[:, E:]
    y_secd = 0.5 * (summed * summed - part2)                      # (bt, E)
    # TODO(synk): nn.Dropout(dropout_fm[1]) treated as identity (eval mode).
    out2 = jnp.dot(y_secd, wf2_ref[...],
                   preferred_element_type=jnp.float32)            # (bt, 1)

    # ---- deep part: 3 x (Linear -> BN(folded) -> ReLU), bf16 MXU operands,
    #      f32 accumulation ----
    y = jnp.maximum(
        jnp.dot(fev.astype(jnp.bfloat16), w1_ref[...],
                preferred_element_type=jnp.float32) + b1, 0.0)
    y = jnp.maximum(
        jnp.dot(y.astype(jnp.bfloat16), w2_ref[...],
                preferred_element_type=jnp.float32) + b2, 0.0)
    y = jnp.maximum(
        jnp.dot(y.astype(jnp.bfloat16), w3_ref[...],
                preferred_element_type=jnp.float32) + b3, 0.0)
    # TODO(synk): dropout_deep layers treated as identity (eval mode).
    out3 = jnp.dot(y, wf3_ref[...],
                   preferred_element_type=jnp.float32)            # (bt, 1)

    out_ref[...] = (out1 + out2 + out3 + bf).astype(out_ref.dtype)


# ------------------------------ JAX wrapper -------------------------------- #
def deepfm_forward(params, feat_index, feat_value, *, batch_tile=1024):
    """DeepFM forward. feat_index:(B,F) int32, feat_value:(B,F) f32 -> (B,1)."""
    B, F = feat_value.shape
    E = params["feat_emb"].shape[1]
    H1 = params["w1"].shape[1]
    H2 = params["w2"].shape[1]
    H3 = params["w3"].shape[1]
    FE = F * E

    # --- batch tiling: large tiles amortise per-step overhead, but keep the
    # grid at >= 2 steps so both v7x TensorCores get work. ---
    bt = batch_tile
    if B <= bt:
        bt = max(8, (((B + 1) // 2) + 7) // 8 * 8)     # ~ceil(B/2), 8-aligned
    Bp = ((B + bt - 1) // bt) * bt
    pad = Bp - B
    if pad:
        # Padded rows gather embedding row 0 (valid) and are discarded below.
        feat_index = jnp.pad(feat_index, ((0, pad), (0, 0)))
        feat_value = jnp.pad(feat_value, ((0, pad), (0, 0)))
    feat_value = feat_value.astype(jnp.float32)

    # Embedding gathers (glue).  Gather straight out of a bf16 table so no
    # f32 (Bp, F*E) intermediate slab hits HBM.  (For a real model, cast the
    # table once outside the per-call path.)
    emb_tbl = params["feat_emb"].astype(jnp.bfloat16)
    emb_flat = emb_tbl[feat_index].reshape(Bp, FE)                 # (Bp, FE) bf16

    first_w = params["first_w"][feat_index][:, :, 0].astype(jnp.float32)
    fvfw = jnp.concatenate([feat_value, first_w], axis=1)          # (Bp, 2F) f32

    # Deep-MLP weights streamed as bf16 (MXU native rate, half the weight DMA).
    w1 = params["w1"].astype(jnp.bfloat16)
    w2 = params["w2"].astype(jnp.bfloat16)
    w3 = params["w3"].astype(jnp.bfloat16)

    # Constant 0/1 matrices (hoisted out of the kernel, fetched once):
    #   expand2 (2F, FE):  [b, 2F] @ expand2 == feat_value broadcast to (FE,)
    #   selblk (2FE, 2E):  block_diag(sel, sel) -> [sum(fev), sum(fev^2)]
    eye_fv = jnp.repeat(jnp.eye(F, dtype=jnp.float32), E, axis=1)  # (F, FE)
    expand2 = jnp.concatenate([eye_fv, jnp.zeros_like(eye_fv)], axis=0)
    sel = jnp.tile(jnp.eye(E, dtype=jnp.float32), (F, 1))          # (FE, E)
    zer = jnp.zeros_like(sel)
    selblk = jnp.concatenate(
        [jnp.concatenate([sel, zer], axis=1),
         jnp.concatenate([zer, sel], axis=1)], axis=0)             # (2FE, 2E)

    # Packed bias rows: [b1, b2, b3, bf] padded to a 128-lane row.
    P = ((max(H1, H2, H3, 1) + 127) // 128) * 128

    def pad_row(v):
        v = v.reshape(-1).astype(jnp.float32)
        return jnp.pad(v, (0, P - v.shape[0]))

    bias_pack = jnp.stack([pad_row(params["b1"]), pad_row(params["b2"]),
                           pad_row(params["b3"]), pad_row(params["bf"])], axis=0)

    wf1c = params["wf1"].astype(jnp.float32)                       # (F, 1)
    wf2c = params["wf2"].astype(jnp.float32)                       # (E, 1)
    wf3c = params["wf3"].astype(jnp.float32)                       # (H3, 1)

    grid = (Bp // bt,)

    in_specs = [
        pl.BlockSpec((bt, 2 * F), lambda i: (i, 0)),     # packed [fv | fw] f32
        pl.BlockSpec((bt, FE), lambda i: (i, 0)),        # flat embeddings bf16
        pl.BlockSpec((FE, H1), lambda i: (0, 0)),        # w1 (BN folded) bf16
        pl.BlockSpec((H1, H2), lambda i: (0, 0)),        # w2 bf16
        pl.BlockSpec((H2, H3), lambda i: (0, 0)),        # w3 bf16
        pl.BlockSpec((2 * F, FE), lambda i: (0, 0)),     # expand2 constant
        pl.BlockSpec((2 * FE, 2 * E), lambda i: (0, 0)),  # selblk constant
        pl.BlockSpec((4, P), lambda i: (0, 0)),          # packed bias rows
        pl.BlockSpec((F, 1), lambda i: (0, 0)),          # fc weight (first)
        pl.BlockSpec((E, 1), lambda i: (0, 0)),          # fc weight (second)
        pl.BlockSpec((H3, 1), lambda i: (0, 0)),         # fc weight (deep)
    ]

    macs_per_row = (2 * F * FE + 2 * FE * 2 * E + FE * H1 + H1 * H2 + H2 * H3
                    + F + E + H3)
    cost = pl.CostEstimate(
        flops=2 * Bp * macs_per_row,
        transcendentals=0,
        bytes_accessed=Bp * (2 * F * 4 + FE * 2 + 4)
                       + (FE * H1 + H1 * H2 + H2 * H3) * 2
                       + (2 * F * FE + 4 * FE * E + 4 * P) * 4)

    out = pl.pallas_call(
        deepfm_kernel,
        out_shape=jax.ShapeDtypeStruct((Bp, 1), jnp.float32),
        grid=grid,
        in_specs=in_specs,
        out_specs=pl.BlockSpec((bt, 1), lambda i: (i, 0)),
        compiler_params=pltpu.CompilerParams(
            dimension_semantics=("parallel",),
            # ~5 MiB actually needed at bt=1024; 32 MiB is safe on v5e/v6e/v7x
            # and leaves headroom for bt up to a few thousand rows.
            vmem_limit_bytes=32 * 1024 * 1024),
        cost_estimate=cost,
    )(fvfw, emb_flat, w1, w2, w3, expand2, selblk, bias_pack, wf1c, wf2c, wf3c)
    return out[:B]


# --------------------------- parameter creation ---------------------------- #
def make_params(key, num_feat, num_field, embedding_size, layer_sizes):
    ks = jax.random.split(key, 16)
    E, F = embedding_size, num_field
    all_dims = [F * E] + list(layer_sizes)

    def xavier(k, shape):
        fan_in, fan_out = shape[0], shape[1]
        a = (6.0 / (fan_in + fan_out)) ** 0.5
        return jax.random.uniform(k, shape, jnp.float32, -a, a)

    params = {
        "first_w": xavier(ks[0], (num_feat, 1)),
        "feat_emb": xavier(ks[1], (num_feat, E)),
    }

    eps = 1e-5
    # Linear layers (stored as (in, out)), with eval-mode BatchNorm folded in:
    #   bn(x) = (x - 0)/sqrt(1 + eps) * 1 + 0  ->  scale = 1/sqrt(1+eps)
    bn_scale = 1.0 / (1.0 + eps) ** 0.5
    for i in range(1, len(layer_sizes) + 1):
        d_in, d_out = all_dims[i - 1], all_dims[i]
        bound = 1.0 / (d_in ** 0.5)
        w = jax.random.uniform(ks[2 * i], (d_in, d_out), jnp.float32, -bound, bound)
        b = jax.random.uniform(ks[2 * i + 1], (1, d_out), jnp.float32, -bound, bound)
        params[f"w{i}"] = w * bn_scale
        params[f"b{i}"] = b * bn_scale

    fc_in = F + E + all_dims[-1]
    bound = 1.0 / (fc_in ** 0.5)
    wfc = jax.random.uniform(ks[10], (fc_in, 1), jnp.float32, -bound, bound)
    bfc = jax.random.uniform(ks[11], (1, 1), jnp.float32, -bound, bound)
    # Split the fc weight to match the concat order (first, second, deep).
    params["wf1"] = wfc[:F]
    params["wf2"] = wfc[F:F + E]
    params["wf3"] = wfc[F + E:]
    params["bf"] = bfc
    return params


# ------------------------------ pure-JAX ref ------------------------------- #
def deepfm_ref(params, feat_index, feat_value):
    # Mirrors the kernel's dtype choices (bf16 embedding table, bf16 deep-MLP
    # matmul operands with f32 accumulation) so the comparison checks the
    # kernel math rather than the intentional mixed-precision choices.
    fv = feat_value.astype(jnp.float32)[:, :, None]
    fw = params["first_w"][feat_index]
    y_first = jnp.sum(fw * fv, axis=2)                               # (B, F)
    emb = params["feat_emb"].astype(jnp.bfloat16)[feat_index].astype(jnp.float32)
    fev = emb * fv                                                   # (B, F, E)
    y_secd = 0.5 * (jnp.sum(fev, 1) ** 2 - jnp.sum(fev ** 2, 1))     # (B, E)
    y = fev.reshape(fev.shape[0], -1)
    for i in (1, 2, 3):
        w = params[f"w{i}"].astype(jnp.bfloat16)
        y = jnp.maximum(
            jnp.dot(y.astype(jnp.bfloat16), w,
                    preferred_element_type=jnp.float32) + params[f"b{i}"], 0.0)
    return (y_first @ params["wf1"] + y_secd @ params["wf2"]
            + y @ params["wf3"] + params["bf"])


if __name__ == "__main__":
    num_feat = 100
    num_field = 8
    embedding_size = 16
    layer_sizes = [64, 64, 64]
    batch = 300            # not a tile multiple: exercises padding + 2-step grid

    key = jax.random.PRNGKey(0)
    k_params, k_idx, k_val = jax.random.split(key, 3)

    params = make_params(k_params, num_feat, num_field, embedding_size, layer_sizes)
    feat_index = jax.random.randint(k_idx, (batch, num_field), 0, num_feat,
                                    dtype=jnp.int32)
    feat_value = jax.random.uniform(k_val, (batch, num_field), jnp.float32)

    out = deepfm_forward(params, feat_index, feat_value, batch_tile=1024)
    out = jax.block_until_ready(out)

    ref = deepfm_ref(params, feat_index, feat_value)
    assert out.shape == (batch, 1)
    max_err = float(jnp.max(jnp.abs(out - ref)))
    # Slightly looser atol than pure-f32: both paths use bf16 MXU operands and
    # may differ in accumulation order / occasional 1-ulp bf16 rounding.
    assert jnp.allclose(out, ref, atol=2e-3, rtol=2e-3), (
        f"mismatch vs JAX reference, max abs err {max_err}")
    print("KERNEL_OK")
</pallas_src>

<mosaic_0001>
module attributes {stable_mosaic.version = 11 : i64} {
  func.func @deepfm_kernel(%arg0: i32, %arg1: memref<152x16xf32, #tpu.memory_space<vmem>>, %arg2: memref<152x128xbf16, #tpu.memory_space<vmem>>, %arg3: memref<128x64xbf16, #tpu.memory_space<vmem>>, %arg4: memref<64x64xbf16, #tpu.memory_space<vmem>>, %arg5: memref<64x64xbf16, #tpu.memory_space<vmem>>, %arg6: memref<16x128xf32, #tpu.memory_space<vmem>>, %arg7: memref<256x32xf32, #tpu.memory_space<vmem>>, %arg8: memref<4x128xf32, #tpu.memory_space<vmem>>, %arg9: memref<8x1xf32, #tpu.memory_space<vmem>>, %arg10: memref<16x1xf32, #tpu.memory_space<vmem>>, %arg11: memref<64x1xf32, #tpu.memory_space<vmem>>, %arg12: memref<152x1xf32, #tpu.memory_space<vmem>>) attributes {dimension_semantics = [#tpu.dimension_semantics<parallel>], iteration_bounds = array<i64: 2>, scalar_prefetch = 0 : i64, scratch_operands = 0 : i64, tpu.core_type = #tpu.core_type<tc>, window_params = [{transform_indices = @transform_0, window_bounds = array<i64: 152, 16>}, {transform_indices = @transform_1, window_bounds = array<i64: 152, 128>}, {pipeline_mode = #tpu.pipeline_mode<synchronous>, transform_indices = @transform_2, window_bounds = array<i64: 128, 64>}, {pipeline_mode = #tpu.pipeline_mode<synchronous>, transform_indices = @transform_3, window_bounds = array<i64: 64, 64>}, {pipeline_mode = #tpu.pipeline_mode<synchronous>, transform_indices = @transform_4, window_bounds = array<i64: 64, 64>}, {pipeline_mode = #tpu.pipeline_mode<synchronous>, transform_indices = @transform_5, window_bounds = array<i64: 16, 128>}, {pipeline_mode = #tpu.pipeline_mode<synchronous>, transform_indices = @transform_6, window_bounds = array<i64: 256, 32>}, {pipeline_mode = #tpu.pipeline_mode<synchronous>, transform_indices = @transform_7, window_bounds = array<i64: 4, 128>}, {pipeline_mode = #tpu.pipeline_mode<synchronous>, transform_indices = @transform_8, window_bounds = array<i64: 8, 1>}, {pipeline_mode = #tpu.pipeline_mode<synchronous>, transform_indices = @transform_9, window_bounds = array<i64: 16, 1>}, {pipeline_mode = #tpu.pipeline_mode<synchronous>, transform_indices = @transform_10, window_bounds = array<i64: 64, 1>}, {transform_indices = @transform_11, window_bounds = array<i64: 152, 1>}]} {
    %c0 = arith.constant 0 : index
    %c0_0 = arith.constant 0 : index
    %0 = vector.load %arg1[%c0, %c0_0] : memref<152x16xf32, #tpu.memory_space<vmem>>, vector<152x16xf32>
    %c0_1 = arith.constant 0 : index
    %c0_2 = arith.constant 0 : index
    %1 = vector.load %arg2[%c0_1, %c0_2] : memref<152x128xbf16, #tpu.memory_space<vmem>>, vector<152x128xbf16>
    %2 = arith.extf %1 : vector<152x128xbf16> to vector<152x128xf32>
    %c0_3 = arith.constant 0 : index
    %c0_4 = arith.constant 0 : index
    %3 = vector.load %arg8[%c0_3, %c0_4] : memref<4x128xf32, #tpu.memory_space<vmem>>, vector<4x128xf32>
    %4 = vector.extract_strided_slice %3 {offsets = [0, 0], sizes = [1, 64], strides = [1, 1]} : vector<4x128xf32> to vector<1x64xf32>
    %5 = vector.extract_strided_slice %3 {offsets = [1, 0], sizes = [1, 64], strides = [1, 1]} : vector<4x128xf32> to vector<1x64xf32>
    %6 = vector.extract_strided_slice %3 {offsets = [2, 0], sizes = [1, 64], strides = [1, 1]} : vector<4x128xf32> to vector<1x64xf32>
    %7 = vector.extract_strided_slice %3 {offsets = [3, 0], sizes = [1, 1], strides = [1, 1]} : vector<4x128xf32> to vector<1x1xf32>
    %c0_5 = arith.constant 0 : index
    %c0_6 = arith.constant 0 : index
    %8 = vector.load %arg6[%c0_5, %c0_6] : memref<16x128xf32, #tpu.memory_space<vmem>>, vector<16x128xf32>
    %cst = arith.constant dense<0.000000e+00> : vector<152x128xf32>
    %9 = tpu.matmul %0, %8, %cst {dimension_numbers = #tpu.dot_dimension_numbers<[1], [0], [0], [1], [0, 0, 1, 1], [], []>} : vector<152x16xf32>, vector<16x128xf32>, vector<152x128xf32> -> vector<152x128xf32>
    %10 = arith.mulf %2, %9 : vector<152x128xf32>
    %11 = vector.extract_strided_slice %0 {offsets = [0, 0], sizes = [152, 8], strides = [1, 1]} : vector<152x16xf32> to vector<152x8xf32>
    %12 = vector.extract_strided_slice %0 {offsets = [0, 8], sizes = [152, 8], strides = [1, 1]} : vector<152x16xf32> to vector<152x8xf32>
    %13 = arith.mulf %11, %12 : vector<152x8xf32>
    %c0_7 = arith.constant 0 : index
    %c0_8 = arith.constant 0 : index
    %14 = vector.load %arg9[%c0_7, %c0_8] : memref<8x1xf32, #tpu.memory_space<vmem>>, vector<8x1xf32>
    %cst_9 = arith.constant dense<0.000000e+00> : vector<152x1xf32>
    %15 = tpu.matmul %13, %14, %cst_9 {dimension_numbers = #tpu.dot_dimension_numbers<[1], [0], [0], [1], [0, 0, 1, 1], [], []>} : vector<152x8xf32>, vector<8x1xf32>, vector<152x1xf32> -> vector<152x1xf32>
    %16 = arith.mulf %10, %10 : vector<152x128xf32>
    %17 = tpu.concatenate %10, %16 in 1 : vector<152x128xf32>, vector<152x128xf32> -> vector<152x256xf32>
    %c0_10 = arith.constant 0 : index
    %c0_11 = arith.constant 0 : index
    %18 = vector.load %arg7[%c0_10, %c0_11] : memref<256x32xf32, #tpu.memory_space<vmem>>, vector<256x32xf32>
    %cst_12 = arith.constant dense<0.000000e+00> : vector<152x32xf32>
    %19 = tpu.matmul %17, %18, %cst_12 {dimension_numbers = #tpu.dot_dimension_numbers<[1], [0], [0], [1], [0, 0, 1, 1], [], []>} : vector<152x256xf32>, vector<256x32xf32>, vector<152x32xf32> -> vector<152x32xf32>
    %20 = vector.extract_strided_slice %19 {offsets = [0, 0], sizes = [152, 16], strides = [1, 1]} : vector<152x32xf32> to vector<152x16xf32>
    %21 = vector.extract_strided_slice %19 {offsets = [0, 16], sizes = [152, 16], strides = [1, 1]} : vector<152x32xf32> to vector<152x16xf32>
    %22 = arith.mulf %20, %20 : vector<152x16xf32>
    %23 = arith.subf %22, %21 : vector<152x16xf32>
    %cst_13 = arith.constant 5.000000e-01 : f32
    %24 = vector.broadcast %cst_13 : f32 to vector<152x16xf32>
    %25 = arith.mulf %24, %23 : vector<152x16xf32>
    %c0_14 = arith.constant 0 : index
    %c0_15 = arith.constant 0 : index
    %26 = vector.load %arg10[%c0_14, %c0_15] : memref<16x1xf32, #tpu.memory_space<vmem>>, vector<16x1xf32>
    %cst_16 = arith.constant dense<0.000000e+00> : vector<152x1xf32>
    %27 = tpu.matmul %25, %26, %cst_16 {dimension_numbers = #tpu.dot_dimension_numbers<[1], [0], [0], [1], [0, 0, 1, 1], [], []>} : vector<152x16xf32>, vector<16x1xf32>, vector<152x1xf32> -> vector<152x1xf32>
    %28 = arith.truncf %10 : vector<152x128xf32> to vector<152x128xbf16>
    %c0_17 = arith.constant 0 : index
    %c0_18 = arith.constant 0 : index
    %29 = vector.load %arg3[%c0_17, %c0_18] : memref<128x64xbf16, #tpu.memory_space<vmem>>, vector<128x64xbf16>
    %cst_19 = arith.constant dense<0.000000e+00> : vector<152x64xf32>
    %30 = tpu.matmul %28, %29, %cst_19 {dimension_numbers = #tpu.dot_dimension_numbers<[1], [0], [0], [1], [0, 0, 1, 1], [], []>} : vector<152x128xbf16>, vector<128x64xbf16>, vector<152x64xf32> -> vector<152x64xf32>
    %31 = vector.broadcast %4 : vector<1x64xf32> to vector<152x64xf32>
    %32 = arith.addf %30, %31 : vector<152x64xf32>
    %cst_20 = arith.constant 0.000000e+00 : f32
    %33 = vector.broadcast %cst_20 : f32 to vector<152x64xf32>
    %34 = arith.maximumf %32, %33 : vector<152x64xf32>
    %35 = arith.truncf %34 : vector<152x64xf32> to vector<152x64xbf16>
    %c0_21 = arith.constant 0 : index
    %c0_22 = arith.constant 0 : index
    %36 = vector.load %arg4[%c0_21, %c0_22] : memref<64x64xbf16, #tpu.memory_space<vmem>>, vector<64x64xbf16>
    %cst_23 = arith.constant dense<0.000000e+00> : vector<152x64xf32>
    %37 = tpu.matmul %35, %36, %cst_23 {dimension_numbers = #tpu.dot_dimension_numbers<[1], [0], [0], [1], [0, 0, 1, 1], [], []>} : vector<152x64xbf16>, vector<64x64xbf16>, vector<152x64xf32> -> vector<152x64xf32>
    %38 = vector.broadcast %5 : vector<1x64xf32> to vector<152x64xf32>
    %39 = arith.addf %37, %38 : vector<152x64xf32>
    %cst_24 = arith.constant 0.000000e+00 : f32
    %40 = vector.broadcast %cst_24 : f32 to vector<152x64xf32>
    %41 = arith.maximumf %39, %40 : vector<152x64xf32>
    %42 = arith.truncf %41 : vector<152x64xf32> to vector<152x64xbf16>
    %c0_25 = arith.constant 0 : index
    %c0_26 = arith.constant 0 : index
    %43 = vector.load %arg5[%c0_25, %c0_26] : memref<64x64xbf16, #tpu.memory_space<vmem>>, vector<64x64xbf16>
    %cst_27 = arith.constant dense<0.000000e+00> : vector<152x64xf32>
    %44 = tpu.matmul %42, %43, %cst_27 {dimension_numbers = #tpu.dot_dimension_numbers<[1], [0], [0], [1], [0, 0, 1, 1], [], []>} : vector<152x64xbf16>, vector<64x64xbf16>, vector<152x64xf32> -> vector<152x64xf32>
    %45 = vector.broadcast %6 : vector<1x64xf32> to vector<152x64xf32>
    %46 = arith.addf %44, %45 : vector<152x64xf32>
    %cst_28 = arith.constant 0.000000e+00 : f32
    %47 = vector.broadcast %cst_28 : f32 to vector<152x64xf32>
    %48 = arith.maximumf %46, %47 : vector<152x64xf32>
    %c0_29 = arith.constant 0 : index
    %c0_30 = arith.constant 0 : index
    %49 = vector.load %arg11[%c0_29, %c0_30] : memref<64x1xf32, #tpu.memory_space<vmem>>, vector<64x1xf32>
    %cst_31 = arith.constant dense<0.000000e+00> : vector<152x1xf32>
    %50 = tpu.matmul %48, %49, %cst_31 {dimension_numbers = #tpu.dot_dimension_numbers<[1], [0], [0], [1], [0, 0, 1, 1], [], []>} : vector<152x64xf32>, vector<64x1xf32>, vector<152x1xf32> -> vector<152x1xf32>
    %51 = arith.addf %15, %27 : vector<152x1xf32>
    %52 = arith.addf %51, %50 : vector<152x1xf32>
    %53 = vector.broadcast %7 : vector<1x1xf32> to vector<152x1xf32>
    %54 = arith.addf %52, %53 : vector<152x1xf32>
    %c0_32 = arith.constant 0 : index
    %c0_33 = arith.constant 0 : index
    %55 = vector.load %arg12[%c0_32, %c0_33] : memref<152x1xf32, #tpu.memory_space<vmem>>, vector<152x1xf32>
    tpu.vector_store %arg12[%c0_32, %c0_33], %54 {strides = array<i32>} : memref<152x1xf32, #tpu.memory_space<vmem>>, vector<152x1xf32>,
    return
  }
  func.func @transform_0(%arg0: i32) -> (i32, i32) {
    %c0_i32 = arith.constant 0 : i32
    %c0_i32_0 = arith.constant 0 : i32
    return %arg0, %c0_i32 : i32, i32
  }
  func.func @transform_1(%arg0: i32) -> (i32, i32) {
    %c0_i32 = arith.constant 0 : i32
    %c0_i32_0 = arith.constant 0 : i32
    return %arg0, %c0_i32 : i32, i32
  }
  func.func @transform_2(%arg0: i32) -> (i32, i32) {
    %c0_i32 = arith.constant 0 : i32
    %c0_i32_0 = arith.constant 0 : i32
    %c0_i32_1 = arith.constant 0 : i32
    return %c0_i32, %c0_i32_0 : i32, i32
  }
  func.func @transform_3(%arg0: i32) -> (i32, i32) {
    %c0_i32 = arith.constant 0 : i32
    %c0_i32_0 = arith.constant 0 : i32
    %c0_i32_1 = arith.constant 0 : i32
    return %c0_i32, %c0_i32_0 : i32, i32
  }
  func.func @transform_4(%arg0: i32) -> (i32, i32) {
    %c0_i32 = arith.constant 0 : i32
    %c0_i32_0 = arith.constant 0 : i32
    %c0_i32_1 = arith.constant 0 : i32
    return %c0_i32, %c0_i32_0 : i32, i32
  }
  func.func @transform_5(%arg0: i32) -> (i32, i32) {
    %c0_i32 = arith.constant 0 : i32
    %c0_i32_0 = arith.constant 0 : i32
    %c0_i32_1 = arith.constant 0 : i32
    return %c0_i32, %c0_i32_0 : i32, i32
  }
  func.func @transform_6(%arg0: i32) -> (i32, i32) {
    %c0_i32 = arith.constant 0 : i32
    %c0_i32_0 = arith.constant 0 : i32
    %c0_i32_1 = arith.constant 0 : i32
    return %c0_i32, %c0_i32_0 : i32, i32
  }
  func.func @transform_7(%arg0: i32) -> (i32, i32) {
    %c0_i32 = arith.constant 0 : i32
    %c0_i32_0 = arith.constant 0 : i32
    %c0_i32_1 = arith.constant 0 : i32
    return %c0_i32, %c0_i32_0 : i32, i32
  }
  func.func @transform_8(%arg0: i32) -> (i32, i32) {
    %c0_i32 = arith.constant 0 : i32
    %c0_i32_0 = arith.constant 0 : i32
    %c0_i32_1 = arith.constant 0 : i32
    return %c0_i32, %c0_i32_0 : i32, i32
  }
  func.func @transform_9(%arg0: i32) -> (i32, i32) {
    %c0_i32 = arith.constant 0 : i32
    %c0_i32_0 = arith.constant 0 : i32
    %c0_i32_1 = arith.constant 0 : i32
    return %c0_i32, %c0_i32_0 : i32, i32
  }
  func.func @transform_10(%arg0: i32) -> (i32, i32) {
    %c0_i32 = arith.constant 0 : i32
    %c0_i32_0 = arith.constant 0 : i32
    %c0_i32_1 = arith.constant 0 : i32
    return %c0_i32, %c0_i32_0 : i32, i32
  }
  func.func @transform_11(%arg0: i32) -> (i32, i32) {
    %c0_i32 = arith.constant 0 : i32
    %c0_i32_0 = arith.constant 0 : i32
    return %arg0, %c0_i32 : i32, i32
  }
}

</mosaic_0001>

<bundles_post_ra>
// kernel: tpu_custom_call.1
= control target key start
LH: loop header
LB: loop body
LE: loop exit
PB: predicated region body
PF: predicated region fallthrough
CT: control target
= control target key end

     0   :  { %s3414_s17 = smov 0   ;;  %s4555_s0 = inlined_call_operand.vmem [shape: f32[304,16], index: 0, kind: input, shape index: {}]   ;;  %s4556_s1 = inlined_call_operand.vmem [shape: bf16[304,128], index: 1, kind: input, shape index: {}]   ;;  %s4557_s2 = inlined_call_operand.vmem [shape: bf16[128,64], index: 2, kind: input, shape index: {}]   ;;  %s4558_s3 = inlined_call_operand.vmem [shape: bf16[64,64], index: 3, kind: input, shape index: {}]   ;;  %s4559_s4 = inlined_call_operand.vmem [shape: bf16[64,64], index: 4, kind: input, shape index: {}]   ;;  %s4560_s5 = inlined_call_operand.vmem [shape: f32[16,128], index: 5, kind: input, shape index: {}]   ;;  %s4561_s6 = inlined_call_operand.vmem [shape: f32[256,32], index: 6, kind: input, shape index: {}]   ;;  %s4562_s7 = inlined_call_operand.vmem [shape: f32[4,128], index: 7, kind: input, shape index: {}]   ;;  %s4563_s8 = inlined_call_operand.vmem [shape: f32[8,1], index: 8, kind: input, shape index: {}]   ;;  %s4564_s9 = inlined_call_operand.vmem [shape: f32[16,1], index: 9, kind: input, shape index: {}]   ;;  %s4565_s10 = inlined_call_operand.vmem [shape: f32[64,1], index: 10, kind: input, shape index: {}]   ;;  %s4566_s11 = inlined_call_operand.vmem [shape: f32[304,1], index: 11, kind: output, shape index: {}]  }
   0x1 LB: > { %s2547_s18 = sadd.s32 4294967295, %s3347_s17   ;;  %p2551_p0 = scmp.ge.s32.totalorder %s3347_s17, 1  ;;  %s3347_s17 = sphi %s3414_s17, %s21_s17  }
   0x2   : > { %p349_p1 = scmp.lt.s32.totalorder %s3347_s17, 3 }
   0x4   : > { %p350_p2 = pnand %p2551_p0, %p349_p1 }
   0x5   : > { %v471_v0 = vld [vmem:[%s4560_s5] sm:$0xff] (!%p350_p2)  ;;  %v472_v1 = vld [vmem:[%s4560_s5 + $0x8] sm:$0xff] (!%p350_p2)  ;;  %s394_s23 = smul.u32 (!%p350_p2), 19, %s2547_s18  ;;  %v3349_v2 = vmov (!%p350_p2), 0.0|0.0   ;;  %vm3350_vm0 = vmmov (!%p350_p2), 0   ;;  %v3351_v4 = vmov (!%p350_p2), 0.0  }
   0x6   : > { %353 = sbr.rel (%p350_p2) target bundleno = 1369 (0x559), region = 64  ;;  %3194 = vmatprep.subr.bf16.mxu0 (!%p350_p2), %v3349_v2  ;;  %v3195_v3 = vpack.c.bf16 (!%p350_p2), %v472_v1, %v471_v0  ;;  %2852 = vmatprep.mubr.msk.f32.mxu0 (!%p350_p2), %vm3350_vm0, %v3351_v4  ;;  %v806_v5 = vld [vmem:[%s4561_s6] sm:$0xff] (!%p350_p2)  ;;  %v807_v6 = vld [vmem:[%s4561_s6 + $0x8] sm:$0xff] (!%p350_p2)  ;;  %v808_v8 = vld [vmem:[%s4561_s6 + $0x10] sm:$0xff] (!%p350_p2)  ;;  %vm473_vm1 = vcmask (!%p350_p2), 130048   ;;  %s3352_s26 = smov (!%p350_p2), 112  }
   0x7   : > { %p395_p3 = scmp.lt.s32.totalorder (!%p350_p2), %s394_s23, 37  ;;  %v3198_v7 = vpack.c.bf16 (!%p350_p2), %v807_v6, %v806_v5  ;;  %3260 = vmatprep.subr.bf16.mxu1 (!%p350_p2), %v3349_v2  ;;  %v809_v9 = vld [vmem:[%s4561_s6 + $0x18] sm:$0xff] (!%p350_p2)  ;;  %v810_v11 = vld [vmem:[%s4561_s6 + $0x20] sm:$0xff] (!%p350_p2)  ;;  %v811_v12 = vld [vmem:[%s4561_s6 + $0x28] sm:$0xff] (!%p350_p2)  ;;  %vm1605_vm2 = vcmask (!%p350_p2), 523264   ;;  %vm2199_vm3 = vcmask (!%p350_p2), 64512  }
   0x8   : > { %3196 = vmatpush3.bf16.msra.mxu0 (!%p350_p2), %v3195_v3  ;;  %v3201_v10 = vpack.c.bf16 (!%p350_p2), %v809_v9, %v808_v8  ;;  %v3204_v15 = vpack.c.bf16 (!%p350_p2), %v811_v12, %v810_v11  ;;  %v812_v16 = vld [vmem:[%s4561_s6 + $0x30] sm:$0xff] (!%p350_p2)  ;;  %v813_v17 = vld [vmem:[%s4561_s6 + $0x38] sm:$0xff] (!%p350_p2)  ;;  %v814_v20 = vld [vmem:[%s4561_s6 + $0x40] sm:$0xff] (!%p350_p2)  ;;  %vm2459_vm4 = vcmask (!%p350_p2), 7168  }
   0x9   : > { %3197 = vmatprep.subr.bf16.mxu0 (!%p350_p2), %v3349_v2  ;;  %3276 = vmatpush1.bf16.msra.mxu1 (!%p350_p2), %v3198_v7  ;;  %v3207_v19 = vpack.c.bf16 (!%p350_p2), %v813_v17, %v812_v16  ;;  %v815_v21 = vld [vmem:[%s4561_s6 + $0x48] sm:$0xff] (!%p350_p2)  ;;  %v816_v23 = vld [vmem:[%s4561_s6 + $0x50] sm:$0xff] (!%p350_p2)  ;;  %v817_v24 = vld [vmem:[%s4561_s6 + $0x58] sm:$0xff] (!%p350_p2) }
   0xa   : > { %3261 = vmatprep.subr.bf16.mxu1 (!%p350_p2), %v3349_v2  ;;  %v3210_v25 = vpack.c.bf16 (!%p350_p2), %v815_v21, %v814_v20  ;;  %v818_v27 = vld [vmem:[%s4561_s6 + $0x60] sm:$0xff] (!%p350_p2)  ;;  %v819_v28 = vld [vmem:[%s4561_s6 + $0x68] sm:$0xff] (!%p350_p2)  ;;  %v3213_v29 = vpack.c.bf16 (!%p350_p2), %v817_v24, %v816_v23  ;;  %v820_v31 = vld [vmem:[%s4561_s6 + $0x70] sm:$0xff] (!%p350_p2) }
   0xb   : > { %v821_v32 = vld [vmem:[%s4561_s6 + $0x78] sm:$0xff] (!%p350_p2)  ;;  %v3216_v33 = vpack.c.bf16 (!%p350_p2), %v819_v28, %v818_v27  ;;  %v822_v36 = vld [vmem:[%s4561_s6 + $0x80] sm:$0xff] (!%p350_p2)  ;;  %v823_v37 = vld [vmem:[%s4561_s6 + $0x88] sm:$0xff] (!%p350_p2) }
   0xc   : > { %v3219_v35 = vpack.c.bf16 (!%p350_p2), %v821_v32, %v820_v31  ;;  %v3222_v39 = vpack.c.bf16 (!%p350_p2), %v823_v37, %v822_v36  ;;  %v824_v40 = vld [vmem:[%s4561_s6 + $0x90] sm:$0xff] (!%p350_p2)  ;;  %v825_v41 = vld [vmem:[%s4561_s6 + $0x98] sm:$0xff] (!%p350_p2)  ;;  %v826_v44 = vld [vmem:[%s4561_s6 + $0xa0] sm:$0xff] (!%p350_p2) }
   0xd   : > { %s4568_s23 = smov (!%p395_p3, %s394_s23), 37  ;;  %3277 = vmatpush1.bf16.msra.mxu1 %v3201_v10  ;;  %v3225_v43 = vpack.c.bf16 %v825_v41, %v824_v40  ;;  %v827_v45 = vld [vmem:[%s4561_s6 + $0xa8] sm:$0xff]  ;;  %v828_v48 = vld [vmem:[%s4561_s6 + $0xb0] sm:$0xff]  ;;  %v829_v49 = vld [vmem:[%s4561_s6 + $0xb8] sm:$0xff] }
   0xe   : > { %s2552_s13 = sshll.u32 %s4568_s23, 3  ;;  %3262 = vmatprep.subr.bf16.mxu1 %v3349_v2  ;;  %v3228_v47 = vpack.c.bf16 %v827_v45, %v826_v44  ;;  %v3231_v51 = vpack.c.bf16 %v829_v49, %v828_v48  ;;  %v830_v52 = vld [vmem:[%s4561_s6 + $0xc0] sm:$0xff]  ;;  %v831_v53 = vld [vmem:[%s4561_s6 + $0xc8] sm:$0xff]  ;;  %v832_v56 = vld [vmem:[%s4561_s6 + $0xd0] sm:$0xff]  ;;  %s2553_s14 = sshll.u32 %s4568_s23, 2 }
   0xf   : > { %s3454_s16 = scalar_lea.vmem %s4555_s0, %s2552_s13  ;;  %v3234_v55 = vpack.c.bf16 %v831_v53, %v830_v52  ;;  %v833_v57 = vld [vmem:[%s4561_s6 + $0xd8] sm:$0xff]  ;;  %v834_v60 = vld [vmem:[%s4561_s6 + $0xe0] sm:$0xff]  ;;  %v835_v61 = vld [vmem:[%s4561_s6 + $0xe8] sm:$0xff]  ;;  %s3669_s19 = scalar_lea.vmem %s4556_s1, %s2553_s14 }
  0x10   : > { %v413_v13 = vld [vmem:[%s3454_s16] sm:$0xff]  ;;  %v414_v14 = vld [vmem:[%s3454_s16 + $0x8] sm:$0xff]  ;;  %v415_v18 = vld [vmem:[%s3454_s16 + $0x10] sm:$0xff]  ;;  %v3237_v59 = vpack.c.bf16 %v833_v57, %v832_v56  ;;  %v3240_v63 = vpack.c.bf16 %v835_v61, %v834_v60 }
  0x11   : > { %2853 = vmatmul.mubr.msk.f32.vlgmr.msra.gmra.mrb[0].mxu0 %vm473_vm1, %v413_v13  ;;  %3278 = vmatpush1.bf16.msra.mxu1 %v3204_v15  ;;  %v416_v22 = vld [vmem:[%s3454_s16 + $0x18] sm:$0xff]  ;;  %v417_v26 = vld [vmem:[%s3454_s16 + $0x20] sm:$0xff]  ;;  %v418_v30 = vld [vmem:[%s3454_s16 + $0x28] sm:$0xff] }
  0x12   : > { %2855 = vmatprep.mubr.msk.f32.mxu0 %vm3350_vm0, %v3351_v4  ;;  %3199 = vmatpush1.bf16.msra.mxu0 %v3198_v7  ;;  %v419_v34 = vld [vmem:[%s3454_s16 + $0x30] sm:$0xff]  ;;  %v420_v38 = vld [vmem:[%s3454_s16 + $0x38] sm:$0xff]  ;;  %v421_v42 = vld [vmem:[%s3454_s16 + $0x40] sm:$0xff] }
  0x13   : > { %3200 = vmatprep.subr.bf16.mxu0 %v3349_v2  ;;  %3263 = vmatprep.subr.bf16.mxu1 %v3349_v2  ;;  %v422_v46 = vld [vmem:[%s3454_s16 + $0x48] sm:$0xff]  ;;  %v423_v50 = vld [vmem:[%s3454_s16 + $0x50] sm:$0xff]  ;;  %v424_v54 = vld [vmem:[%s3454_s16 + $0x58] sm:$0xff] }
  0x14   : > { %v425_v58 = vld [vmem:[%s3454_s16 + $0x60] sm:$0xff]  ;;  %v3612_v62 = vld [vmem:[%s3454_s16 + $0x68] sm:$0xff]  ;;  %v3621_v0 = vld [vmem:[%s3454_s16 + $0x70] sm:$0xff] }
  0x15   : > { %2856 = vmatmul.mubr.msk.f32.gmra.mrb[2].mxu0 %vm473_vm1, %v414_v14  ;;  %3279 = vmatpush1.bf16.msra.mxu1 %v3207_v19  ;;  %v3629_v1 = vld [vmem:[%s3454_s16 + $0x78] sm:$0xff]  ;;  %v3637_v3 = vld [vmem:[%s3454_s16 + $0x80] sm:$0xff]  ;;  %v3644_v5 = vld [vmem:[%s3454_s16 + $0x88] sm:$0xff] }
  0x16   : > { %2858 = vmatprep.mubr.msk.f32.mxu0 %vm3350_vm0, %v3351_v4  ;;  %3202 = vmatpush1.bf16.msra.mxu0 %v3201_v10  ;;  %v3651_v6 = vld [vmem:[%s3454_s16 + $0x90] sm:$0xff]  ;;  %v837_v8 = vld [vmem:[%s4561_s6 + $0xf8] sm:$0xff]  ;;  %v3305_v10 = vld [vmem:[%s4557_s2] sm:$0xff]  }
  0x17   : > { %3203 = vmatprep.subr.bf16.mxu0 %v3349_v2  ;;  %3264 = vmatprep.subr.bf16.mxu1 %v3349_v2  ;;  %v836_v7 = vld [vmem:[%s4561_s6 + $0xf0] sm:$0xff]  ;;  %v2670_v11 = vld [vmem:[%s3669_s19] sm:$0xff]   ;;  %v2705_v17 = vld [vmem:[%s3669_s19 + $0x8] sm:$0xff]  }
  0x18   : > { %v3243_v9 = vpack.c.bf16 %v837_v8, %v836_v7  ;;  %v2671_v12 = vunpack.c.l.bf16 %v2670_v11  ;;  %v2672_v16 = vunpack.c.h.bf16 %v2670_v11  ;;  %v2676_v28 = vunpack.c.h.bf16 %v2705_v17  ;;  %v3307_v45 = vld [vmem:[%s4557_s2 + $0x10] sm:$0xff]   ;;  %v3308_v52 = vld [vmem:[%s4557_s2 + $0x18] sm:$0xff]   ;;  %v2708_v56 = vld [vmem:[%s3669_s19 + $0x20] sm:$0xff]  }
  0x19   : > { %2859 = vmatmul.mubr.msk.f32.gmra.mrb[4].mxu0 %vm473_vm1, %v415_v18  ;;  %3280 = vmatpush1.bf16.msra.mxu1 %v3210_v25 }
  0x1a   : > { %2861 = vmatprep.mubr.msk.f32.mxu0 %vm3350_vm0, %v3351_v4  ;;  %3205 = vmatpush1.bf16.msra.mxu0 %v3204_v15 }
  0x1b   : > { %3206 = vmatprep.subr.bf16.mxu0 %v3349_v2  ;;  %3265 = vmatprep.subr.bf16.mxu1 %v3349_v2 }
  0x1d   : > { %2862 = vmatmul.mubr.msk.f32.gmra.mrb[6].mxu0 %vm473_vm1, %v416_v22  ;;  %3281 = vmatpush1.bf16.msra.mxu1 %v3213_v29  ;;  %v2675_v22 = vunpack.c.l.bf16 %v2705_v17 }
  0x1e   : > { %2864 = vmatprep.mubr.msk.f32.mxu0 %vm3350_vm0, %v3351_v4  ;;  %3208 = vmatpush1.bf16.msra.mxu0 %v3207_v19 }
  0x1f   : > { %3209 = vmatprep.subr.bf16.mxu0 %v3349_v2  ;;  %3266 = vmatprep.subr.bf16.mxu1 %v3349_v2 }
  0x21   : > { %2865 = vmatmul.mubr.msk.f32.gmra.mrb[8].mxu0 %vm473_vm1, %v417_v26  ;;  %3282 = vmatpush1.bf16.msra.mxu1 %v3216_v33 }
  0x22   : > { %2867 = vmatprep.mubr.msk.f32.mxu0 %vm3350_vm0, %v3351_v4  ;;  %3211 = vmatpush1.bf16.msra.mxu0 %v3210_v25 }
  0x23   : > { %3212 = vmatprep.subr.bf16.mxu0 %v3349_v2  ;;  %3267 = vmatprep.subr.bf16.mxu1 %v3349_v2 }
  0x25   : > { %2868 = vmatmul.mubr.msk.f32.gmra.mrb[10].mxu0 %vm473_vm1, %v418_v30  ;;  %3283 = vmatpush1.bf16.msra.mxu1 %v3219_v35 }
  0x26   : > { %2870 = vmatprep.mubr.msk.f32.mxu0 %vm3350_vm0, %v3351_v4  ;;  %3214 = vmatpush1.bf16.msra.mxu0 %v3213_v29  ;;  %v2706_v29 = vld [vmem:[%s3669_s19 + $0x10] sm:$0xff]  }
  0x27   : > { %3215 = vmatprep.subr.bf16.mxu0 %v3349_v2  ;;  %3268 = vmatprep.subr.bf16.mxu1 %v3349_v2  ;;  %v2680_v41 = vunpack.c.h.bf16 %v2706_v29 }
  0x29   : > { %2871 = vmatmul.mubr.msk.f32.gmra.mrb[12].mxu0 %vm473_vm1, %v419_v34  ;;  %3284 = vmatpush1.bf16.msra.mxu1 %v3222_v39  ;;  %v2679_v34 = vunpack.c.l.bf16 %v2706_v29 }
  0x2a   : > { %2873 = vmatprep.mubr.msk.f32.mxu0 %vm3350_vm0, %v3351_v4  ;;  %3217 = vmatpush1.bf16.msra.mxu0 %v3216_v33 }
  0x2b   : > { %3218 = vmatprep.subr.bf16.mxu0 %v3349_v2  ;;  %3269 = vmatprep.subr.bf16.mxu1 %v3349_v2 }
  0x2d   : > { %2874 = vmatmul.mubr.msk.f32.gmra.mrb[14].mxu0 %vm473_vm1, %v420_v38  ;;  %3285 = vmatpush1.bf16.msra.mxu1 %v3225_v43  ;;  %v3306_v38 = vld [vmem:[%s4557_s2 + $0x8] sm:$0xff]  }
  0x2e   : > { %2876 = vmatprep.mubr.msk.f32.mxu0 %vm3350_vm0, %v3351_v4  ;;  %3220 = vmatpush1.bf16.msra.mxu0 %v3219_v35 }
  0x2f   : > { %3221 = vmatprep.subr.bf16.mxu0 %v3349_v2  ;;  %3270 = vmatprep.subr.bf16.mxu1 %v3349_v2 }
  0x31   : > { %2877 = vmatmul.mubr.msk.f32.gmra.mrb[16].mxu0 %vm473_vm1, %v421_v42  ;;  %3286 = vmatpush1.bf16.msra.mxu1 %v3228_v47  ;;  %v2707_v42 = vld [vmem:[%s3669_s19 + $0x18] sm:$0xff]  }
  0x32   : > { %2879 = vmatprep.mubr.msk.f32.mxu0 %vm3350_vm0, %v3351_v4  ;;  %3223 = vmatpush1.bf16.msra.mxu0 %v3222_v39  ;;  %v2683_v48 = vunpack.c.l.bf16 %v2707_v42 }
  0x33   : > { %3224 = vmatprep.subr.bf16.mxu0 %v3349_v2  ;;  %3271 = vmatprep.subr.bf16.mxu1 %v3349_v2 }
  0x35   : > { %2880 = vmatmul.mubr.msk.f32.gmra.mrb[18].mxu0 %vm473_vm1, %v422_v46  ;;  %3287 = vmatpush1.bf16.msra.mxu1 %v3231_v51 }
  0x36   : > { %2882 = vmatprep.mubr.msk.f32.mxu0 %vm3350_vm0, %v3351_v4  ;;  %3226 = vmatpush1.bf16.msra.mxu0 %v3225_v43 }
  0x37   : > { %3227 = vmatprep.subr.bf16.mxu0 %v3349_v2  ;;  %3272 = vmatprep.subr.bf16.mxu1 %v3349_v2 }
  0x39   : > { %2883 = vmatmul.mubr.msk.f32.gmra.mrb[20].mxu0 %vm473_vm1, %v423_v50  ;;  %3288 = vmatpush1.bf16.msra.mxu1 %v3234_v55 }
  0x3a   : > { %2885 = vmatprep.mubr.msk.f32.mxu0 %vm3350_vm0, %v3351_v4  ;;  %3229 = vmatpush1.bf16.msra.mxu0 %v3228_v47 }
  0x3b   : > { %3230 = vmatprep.subr.bf16.mxu0 %v3349_v2  ;;  %3273 = vmatprep.subr.bf16.mxu1 %v3349_v2 }
  0x3d   : > { %2886 = vmatmul.mubr.msk.f32.gmra.mrb[22].mxu0 %vm473_vm1, %v424_v54  ;;  %3289 = vmatpush1.bf16.msra.mxu1 %v3237_v59 }
  0x3e   : > { %2888 = vmatprep.mubr.msk.f32.mxu0 %vm3350_vm0, %v3351_v4  ;;  %3232 = vmatpush1.bf16.msra.mxu0 %v3231_v51 }
  0x3f   : > { %3233 = vmatprep.subr.bf16.mxu0 %v3349_v2  ;;  %3274 = vmatprep.subr.bf16.mxu1 %v3349_v2 }
  0x41   : > { %2889 = vmatmul.mubr.msk.f32.gmra.mrb[24].mxu0 %vm473_vm1, %v425_v58  ;;  %3290 = vmatpush1.bf16.msra.mxu1 %v3240_v63 }
  0x42   : > { %2891 = vmatprep.mubr.msk.f32.mxu0 %vm3350_vm0, %v3351_v4  ;;  %3235 = vmatpush1.bf16.msra.mxu0 %v3234_v55  ;;  %v2684_v55 = vunpack.c.h.bf16 %v2707_v42 }
  0x43   : > { %3236 = vmatprep.subr.bf16.mxu0 %v3349_v2  ;;  %3275 = vmatprep.subr.bf16.mxu1 %v3349_v2 }
  0x45   : > { %2892 = vmatmul.mubr.msk.f32.gmra.mrb[26].mxu0 %vm473_vm1, %v3612_v62  ;;  %3291 = vmatpush1.bf16.msra.mxu1 %v3243_v9 }
  0x46   : > { %2894 = vmatprep.mubr.msk.f32.mxu0 %vm3350_vm0, %v3351_v4  ;;  %3238 = vmatpush1.bf16.msra.mxu0 %v3237_v59  ;;  %v3309_v59 = vld [vmem:[%s4557_s2 + $0x20] sm:$0xff]  }
  0x47   : > { %3239 = vmatprep.subr.bf16.mxu0 %v3349_v2  ;;  %2970 = vmatprep.subr.bf16.mxu1 %v3305_v10 }
  0x49   : > { %2895 = vmatmul.mubr.msk.f32.gmra.mrb[28].mxu0 %vm473_vm1, %v3621_v0 }
  0x4a   : > { %2897 = vmatprep.mubr.msk.f32.mxu0 %vm3350_vm0, %v3351_v4  ;;  %3241 = vmatpush1.bf16.msra.mxu0 %v3240_v63  ;;  %v2687_v63 = vunpack.c.l.bf16 %v2708_v56 }
  0x4b   : > { %3242 = vmatprep.subr.bf16.mxu0 %v3349_v2 }
  0x4d   : > { %2898 = vmatmul.mubr.msk.f32.gmra.mrb[30].mxu0 %vm473_vm1, %v3629_v1 }
  0x4e   : > { %2900 = vmatprep.mubr.msk.f32.mxu0 %vm3350_vm0, %v3351_v4  ;;  %3244 = vmatpush1.bf16.msra.mxu0 %v3243_v9 }
  0x4f   : > { %3245 = vmatprep.subr.bf16.mxu0 %v3349_v2 }
  0x51   : > { %2901 = vmatmul.mubr.msk.f32.gmra.mrb[32].mxu0 %vm473_vm1, %v3637_v3 }
  0x52   : > { %2903 = vmatprep.mubr.msk.f32.mxu0 %vm3350_vm0, %v3351_v4 }
  0x55   : > { %2904 = vmatmul.mubr.msk.f32.gmra.mrb[34].mxu0 %vm473_vm1, %v3644_v5 }
  0x56   : > { %2906 = vmatprep.mubr.msk.f32.mxu0 %vm3350_vm0, %v3351_v4 }
  0x59   : > { %2907 = vmatmul.mubr.msk.f32.gmra.mrb[36].mxu0 %vm473_vm1, %v3651_v6 }
  0xe4   : > { %v597_v13 = vpop.f32.mrb[0].mxu0 }
  0xe5   : > { %v3672_v14 = vmul.f32 %v2671_v12, %v597_v13  ;;  %v2854_v15 = vpop.f32.mrb[1].mxu0  ;;  %v2688_v13 = vunpack.c.h.bf16 %v2708_v56 }
  0xe6   : > { %v2709_v15 = vld [vmem:[%s3669_s19 + $0x28] sm:$0xff]  }
  0xe7   : > { %v787_v18 = vmul.f32 %v3672_v14, %v3672_v14 }
  0xe8   : > { %v602_v19 = vpop.f32.mrb[2].mxu0 }
  0xe9   : > { %v3677_v20 = vmul.f32 %v2672_v16, %v602_v19  ;;  %v2857_v21 = vpop.f32.mrb[3].mxu0  ;;  %902 = vmatprep.mubr.f32.mxu0 %v787_v18  ;;  %v3311_v18 = vld [vmem:[%s4557_s2 + $0x30] sm:$0xff]  }
  0xea   : > { %903 = vmatmul.mubr.f32.vlgmr.msra.gmra.mrb[38].mxu0 %v3672_v14 }
  0xeb   : > { %v788_v23 = vmul.f32 %v3677_v20, %v3677_v20  ;;  %v1350_v24 = vpack.c.bf16 %v3677_v20, %v3672_v14 }
  0xec   : > { %v607_v25 = vpop.f32.mrb[4].mxu0 }
  0xed   : > { %v3684_v26 = vmul.f32 %v2675_v22, %v607_v25  ;;  %v2860_v27 = vpop.f32.mrb[5].mxu0  ;;  %907 = vmatprep.mubr.f32.mxu0 %v788_v23  ;;  %v2691_v22 = vunpack.c.l.bf16 %v2709_v15 }
  0xee   : > { %908 = vmatmul.mubr.f32.gmra.mrb[40].mxu0 %v3677_v20  ;;  %v1131_v20 = vld [vmem:[%s4564_s9] sm:$0xff] }
  0xef   : > { %v789_v30 = vmul.f32 %v3684_v26, %v3684_v26 }
  0xf0   : > { %v612_v31 = vpop.f32.mrb[6].mxu0 }
  0xf1   : > { %v3690_v32 = vmul.f32 %v2676_v28, %v612_v31  ;;  %v2863_v33 = vpop.f32.mrb[7].mxu0  ;;  %912 = vmatprep.mubr.f32.mxu0 %v789_v30  ;;  %v3312_v28 = vld [vmem:[%s4557_s2 + $0x38] sm:$0xff]   ;;  %v2692_v31 = vunpack.c.h.bf16 %v2709_v15 }
  0xf2   : > { %913 = vmatmul.mubr.f32.gmra.mrb[42].mxu0 %v3684_v26  ;;  %v2710_v33 = vld [vmem:[%s3669_s19 + $0x30] sm:$0xff]  }
  0xf3   : > { %v1351_v35 = vpack.c.bf16 %v3690_v32, %v3684_v26  ;;  %v790_v36 = vmul.f32 %v3690_v32, %v3690_v32  ;;  %2913 = vmatprep.mubr.msk.f32.mxu0 %vm3350_vm0, %v3351_v4 }
  0xf4   : > { %v617_v37 = vpop.f32.mrb[8].mxu0 }
  0xf5   : > { %v3702_v39 = vmul.f32 %v2679_v34, %v617_v37  ;;  %v2866_v40 = vpop.f32.mrb[9].mxu0  ;;  %917 = vmatprep.mubr.f32.mxu1 %v790_v36 }
  0xf6   : > { %918 = vmatmul.mubr.f32.vlgmr.msra.gmra.mrb[0].mxu1 %v3690_v32  ;;  %v2695_v40 = vunpack.c.l.bf16 %v2710_v33  ;;  %v3800_v32 = vld [vmem:[%s4558_s3] sm:$0xff]  }
  0xf7   : > { %v791_v43 = vmul.f32 %v3702_v39, %v3702_v39  ;;  %2971 = vmatpush3.bf16.msra.mxu1 %v3305_v10  ;;  %v3310_v10 = vld [vmem:[%s4557_s2 + $0x28] sm:$0xff]  }
  0xf8   : > { %v622_v44 = vpop.f32.mrb[10].mxu0  ;;  %2972 = vmatprep.subr.bf16.mxu1 %v3306_v38 }
  0xf9   : > { %v3711_v46 = vmul.f32 %v2680_v41, %v622_v44  ;;  %v2869_v47 = vpop.f32.mrb[11].mxu0  ;;  %922 = vmatprep.mubr.f32.mxu1 %v791_v43 }
  0xfa   : > { %923 = vmatmul.mubr.f32.gmra.mrb[2].mxu1 %v3702_v39  ;;  %v2696_v47 = vunpack.c.h.bf16 %v2710_v33 }
  0xfb   : > { %v792_v49 = vmul.f32 %v3711_v46, %v3711_v46  ;;  %2973 = vmatpush3.bf16.msra.mxu1 %v3306_v38  ;;  %v1352_v50 = vpack.c.bf16 %v3711_v46, %v3702_v39 }
  0xfc   : > { %v627_v51 = vpop.f32.mrb[12].mxu0  ;;  %2974 = vmatprep.subr.bf16.mxu1 %v3307_v45 }
  0xfd   : > { %v3721_v53 = vmul.f32 %v2683_v48, %v627_v51  ;;  %v2872_v54 = vpop.f32.mrb[13].mxu0  ;;  %927 = vmatprep.mubr.f32.mxu1 %v792_v49  ;;  %v2711_v48 = vld [vmem:[%s3669_s19 + $0x38] sm:$0xff]  }
  0xfe   : > { %928 = vmatmul.mubr.f32.gmra.mrb[4].mxu1 %v3711_v46 }
  0xff   : > { %v793_v57 = vmul.f32 %v3721_v53, %v3721_v53  ;;  %2975 = vmatpush3.bf16.msra.mxu1 %v3307_v45 }
 0x100   : > { %v632_v58 = vpop.f32.mrb[14].mxu0  ;;  %2976 = vmatprep.subr.bf16.mxu1 %v3308_v52 }
 0x101   : > { %v3730_v60 = vmul.f32 %v2684_v55, %v632_v58  ;;  %v2875_v61 = vpop.f32.mrb[15].mxu0  ;;  %932 = vmatprep.mubr.f32.mxu1 %v793_v57  ;;  %v2699_v55 = vunpack.c.l.bf16 %v2711_v48 }
 0x102   : > { %933 = vmatmul.mubr.f32.gmra.mrb[6].mxu1 %v3721_v53 }
 0x103   : > { %v794_v7 = vmul.f32 %v3730_v60, %v3730_v60  ;;  %2977 = vmatpush3.bf16.msra.mxu1 %v3308_v52  ;;  %v1353_v8 = vpack.c.bf16 %v3730_v60, %v3721_v53 }
 0x104   : > { %v637_v9 = vpop.f32.mrb[16].mxu0  ;;  %2978 = vmatprep.subr.bf16.mxu1 %v3309_v59 }
 0x105   : > { %v3740_v11 = vmul.f32 %v2687_v63, %v637_v9  ;;  %v2878_v12 = vpop.f32.mrb[17].mxu0  ;;  %937 = vmatprep.mubr.f32.mxu1 %v794_v7  ;;  %v2700_v63 = vunpack.c.h.bf16 %v2711_v48  ;;  %v2712_v7 = vld [vmem:[%s3669_s19 + $0x40] sm:$0xff]  }
 0x106   : > { %938 = vmatmul.mubr.f32.gmra.mrb[8].mxu1 %v3730_v60  ;;  %v2703_v15 = vunpack.c.l.bf16 %v2712_v7 }
 0x107   : > { %v795_v16 = vmul.f32 %v3740_v11, %v3740_v11  ;;  %2979 = vmatpush3.bf16.msra.mxu1 %v3309_v59 }
 0x108   : > { %v642_v17 = vpop.f32.mrb[18].mxu0  ;;  %2980 = vmatprep.subr.bf16.mxu1 %v3310_v10 }
 0x109   : > { %v3749_v19 = vmul.f32 %v2688_v13, %v642_v17  ;;  %v2881_v21 = vpop.f32.mrb[19].mxu0  ;;  %942 = vmatprep.mubr.f32.mxu1 %v795_v16 }
 0x10a   : > { %943 = vmatmul.mubr.f32.gmra.mrb[10].mxu1 %v3740_v11 }
 0x10b   : > { %v796_v23 = vmul.f32 %v3749_v19, %v3749_v19  ;;  %2981 = vmatpush3.bf16.msra.mxu1 %v3310_v10  ;;  %v1354_v25 = vpack.c.bf16 %v3749_v19, %v3740_v11 }
 0x10c   : > { %v647_v27 = vpop.f32.mrb[20].mxu0  ;;  %2982 = vmatprep.subr.bf16.mxu1 %v3311_v18 }
 0x10d   : > { %v3759_v29 = vmul.f32 %v2691_v22, %v647_v27  ;;  %v2884_v30 = vpop.f32.mrb[21].mxu0  ;;  %947 = vmatprep.mubr.f32.mxu1 %v796_v23  ;;  %v2704_v23 = vunpack.c.h.bf16 %v2712_v7  ;;  %v450_v27 = vld [vmem:[%s3669_s19 + $0x48] sm:$0xf]  ;;  %s3353_s19 = smov 120  }
 0x10e   : > { %948 = vmatmul.mubr.f32.gmra.mrb[12].mxu1 %v3749_v19  ;;  %v469_v33 = vunpack.c.l.bf16 %v450_v27  ;;  %v3881_v27 = vld [vmem:[%s4562_s7] sm:$0xf] }
 0x10f   : > { %v797_v34 = vmul.f32 %v3759_v29, %v3759_v29  ;;  %2983 = vmatpush3.bf16.msra.mxu1 %v3311_v18 }
 0x110   : > { %v652_v36 = vpop.f32.mrb[22].mxu0  ;;  %2984 = vmatprep.subr.bf16.mxu1 %v3312_v28 }
 0x111   : > { %v3765_v37 = vmul.f32 %v2692_v31, %v652_v36  ;;  %v2887_v38 = vpop.f32.mrb[23].mxu0  ;;  %952 = vmatprep.mubr.f32.mxu1 %v797_v34 }
 0x112   : > { %953 = vmatmul.mubr.f32.gmra.mrb[14].mxu1 %v3759_v29 }
 0x113   : > { %v798_v41 = vmul.f32 %v3765_v37, %v3765_v37  ;;  %2985 = vmatpush3.bf16.msra.mxu1 %v3312_v28  ;;  %v1355_v42 = vpack.c.bf16 %v3765_v37, %v3759_v29 }
 0x114   : > { %v657_v43 = vpop.f32.mrb[24].mxu0 }
 0x115   : > { %v703_v44 = vmul.f32 %v2695_v40, %v657_v43  ;;  %v2890_v45 = vpop.f32.mrb[25].mxu0  ;;  %957 = vmatprep.mubr.f32.mxu1 %v798_v41 }
 0x116   : > { %958 = vmatmul.mubr.f32.gmra.mrb[16].mxu1 %v3765_v37 }
 0x117   : > { %v799_v49 = vmul.f32 %v703_v44, %v703_v44 }
 0x118   : > { %v662_v51 = vpop.f32.mrb[26].mxu0 }
 0x119   : > { %v704_v52 = vmul.f32 %v2696_v47, %v662_v51  ;;  %v2893_v54 = vpop.f32.mrb[27].mxu0  ;;  %962 = vmatprep.mubr.f32.mxu1 %v799_v49 }
 0x11a   : > { %963 = vmatmul.mubr.f32.gmra.mrb[18].mxu1 %v703_v44 }
 0x11b   : > { %v800_v56 = vmul.f32 %v704_v52, %v704_v52  ;;  %v1356_v57 = vpack.c.bf16 %v704_v52, %v703_v44 }
 0x11c   : > { %v667_v58 = vpop.f32.mrb[28].mxu0 }
 0x11d   : > { %v705_v59 = vmul.f32 %v2699_v55, %v667_v58  ;;  %v2896_v61 = vpop.f32.mrb[29].mxu0  ;;  %967 = vmatprep.mubr.f32.mxu1 %v800_v56 }
 0x11e   : > { %968 = vmatmul.mubr.f32.gmra.mrb[20].mxu1 %v704_v52 }
 0x11f   : > { %v801_v9 = vmul.f32 %v705_v59, %v705_v59 }
 0x120   : > { %v672_v10 = vpop.f32.mrb[30].mxu0 }
 0x121   : > { %v706_v12 = vmul.f32 %v2700_v63, %v672_v10  ;;  %v2899_v13 = vpop.f32.mrb[31].mxu0  ;;  %972 = vmatprep.mubr.f32.mxu1 %v801_v9 }
 0x122   : > { %973 = vmatmul.mubr.f32.gmra.mrb[22].mxu1 %v705_v59 }
 0x123   : > { %v802_v16 = vmul.f32 %v706_v12, %v706_v12  ;;  %v1357_v17 = vpack.c.bf16 %v706_v12, %v705_v59 }
 0x124   : > { %v677_v18 = vpop.f32.mrb[32].mxu0 }
 0x125   : > { %v707_v21 = vmul.f32 %v2703_v15, %v677_v18  ;;  %v2902_v22 = vpop.f32.mrb[33].mxu0  ;;  %977 = vmatprep.mubr.f32.mxu1 %v802_v16  ;;  %v1376_v15 = vlaneseq }
 0x126   : > { %978 = vmatmul.mubr.f32.gmra.mrb[24].mxu1 %v706_v12 }
 0x127   : > { %v803_v28 = vmul.f32 %v707_v21, %v707_v21  ;;  %v3871_v18 = vshrl.u32 %v1376_v15, 7 }
 0x128   : > { %v682_v29 = vpop.f32.mrb[34].mxu0 }
 0x129   : > { %v708_v30 = vmul.f32 %v2704_v23, %v682_v29  ;;  %v2905_v31 = vpop.f32.mrb[35].mxu0  ;;  %982 = vmatprep.mubr.f32.mxu1 %v803_v28  ;;  %v1378_v23 = vsub.s32 0, %v3871_v18 }
 0x12a   : > { %983 = vmatmul.mubr.f32.gmra.mrb[26].mxu1 %v707_v21 }
 0x12b   : > { %v804_v34 = vmul.f32 %v708_v30, %v708_v30  ;;  %v1358_v36 = vpack.c.bf16 %v708_v30, %v707_v21 }
 0x12c   : > { %v687_v37 = vpop.f32.mrb[36].mxu0 }
 0x12d   : > { %v709_v38 = vmul.f32 %v687_v37, %v469_v33  ;;  %v2908_v40 = vpop.f32.mrb[37].mxu0  ;;  %987 = vmatprep.mubr.f32.mxu1 %v804_v34 }
 0x12e   : > { %988 = vmatmul.mubr.f32.gmra.mrb[28].mxu1 %v708_v30  ;;  %v3888_v30 = vrot.slane %v3881_v27, %v1378_v23 }
 0x12f   : > { %v805_v41 = vmul.f32 %v709_v38, %v709_v38  ;;  %v1359_v14 = vpack.c.bf16 %v709_v38, %v709_v38 }
 0x131   : > { %992 = vmatprep.mubr.f32.mxu1 %v805_v41 }
 0x132   : > { %993 = vmatmul.mubr.f32.gmra.mrb[30].mxu1 %v709_v38 }
 0x133   : > { %2986 = vmatprep.mubr.bf16.mxu1 %v1350_v24  ;;  %v1132_v24 = vld [vmem:[%s4564_s9 + $0x8] sm:$0xff] }
 0x134   : > { %v3246_v26 = vpack.c.bf16 %v1132_v24, %v1131_v20 }
 0x136   : > { %2987 = vmatmul.mubr.bf16.vlgmr.msra.gmra.mrb[32].mxu1 %v1351_v35  ;;  %3247 = vmatpush3.bf16.msra.mxu0 %v3246_v26 }
 0x137   : > { %2990 = vmatprep.mubr.bf16.mxu1 %v1352_v50  ;;  %3006 = vmatprep.subr.bf16.mxu0 %v3800_v32 }
 0x13e   : > { %2991 = vmatmul.mubr.bf16.gmra.mrb[36].mxu1 %v1353_v8 }
 0x13f   : > { %2994 = vmatprep.mubr.bf16.mxu1 %v1354_v25 }
 0x146   : > { %2995 = vmatmul.mubr.bf16.gmra.mrb[40].mxu1 %v1355_v42 }
 0x147   : > { %2998 = vmatprep.mubr.bf16.mxu1 %v1356_v57 }
 0x14e   : > { %2999 = vmatmul.mubr.bf16.gmra.mrb[44].mxu1 %v1357_v17 }
 0x14f   : > { %3002 = vmatprep.mubr.bf16.mxu1 %v1358_v36 }
 0x156   : > { %3003 = vmatmul.mubr.bf16.gmra.mrb[48].mxu1 %v1359_v14 }
 0x1bd   : > { %v3803_v35 = vpop.f32.mrb[38].mxu0 }
 0x1be   : > { %1036 = vrot.lane.b32.xlu0 %v3803_v35, %s3352_s26  ;;  %v906_v39 = vpop.f32.mrb[39].mxu0 }
 0x1c1   : > { %v3807_v46 = vpop.f32.mrb[40].mxu0 }
 0x1c2   : > { %1038 = vrot.lane.b32.xlu0 %v3807_v46, %s3352_s26  ;;  %v911_v50 = vpop.f32.mrb[41].mxu0 }
 0x1c5   : > { %v3811_v53 = vpop.f32.mrb[42].mxu0 }
 0x1c6   : > { %1040 = vrot.lane.b32.xlu1 %v3811_v53, %s3352_s26  ;;  %v916_v60 = vpop.f32.mrb[43].mxu0 }
 0x1c9   : > { %v3815_v8 = vpop.f32.mrb[0].mxu1 }
 0x1ca   : > { %v921_v11 = vpop.f32.mrb[1].mxu1  ;;  %1042 = vrot.lane.b32.xlu1 %v3815_v8, %s3352_s26 }
 0x1cd   : > { %v3819_v19 = vpop.f32.mrb[2].mxu1 }
 0x1ce   : > { %v926_v25 = vpop.f32.mrb[3].mxu1  ;;  %1044 = vrot.lane.b32.xlu0 %v3819_v19, %s3352_s26 }
 0x1d1   : > { %v3823_v42 = vpop.f32.mrb[4].mxu1 }
 0x1d2   : > { %v931_v43 = vpop.f32.mrb[5].mxu1  ;;  %1046 = vrot.lane.b32.xlu1 %v3823_v42, %s3352_s26 }
 0x1d5   : > { %v3827_v44 = vpop.f32.mrb[6].mxu1 }
 0x1d6   : > { %v936_v45 = vpop.f32.mrb[7].mxu1  ;;  %1048 = vrot.lane.b32.xlu0 %v3827_v44, %s3352_s26 }
 0x1d9   : > { %v3831_v47 = vpop.f32.mrb[8].mxu1 }
 0x1da   : > { %v941_v48 = vpop.f32.mrb[9].mxu1  ;;  %1050 = vrot.lane.b32.xlu1 %v3831_v47, %s3352_s26 }
 0x1dd   : > { %v3835_v49 = vpop.f32.mrb[10].mxu1 }
 0x1de   : > { %v946_v51 = vpop.f32.mrb[11].mxu1  ;;  %1052 = vrot.lane.b32.xlu0 %v3835_v49, %s3352_s26 }
 0x1e1   : > { %v3839_v52 = vpop.f32.mrb[12].mxu1 }
 0x1e2   : > { %v951_v54 = vpop.f32.mrb[13].mxu1  ;;  %1054 = vrot.lane.b32.xlu1 %v3839_v52, %s3352_s26 }
 0x1e5   : > { %v3843_v55 = vpop.f32.mrb[14].mxu1 }
 0x1e6   : > { %v956_v56 = vpop.f32.mrb[15].mxu1  ;;  %1056 = vrot.lane.b32.xlu0 %v3843_v55, %s3352_s26 }
 0x1e9   : > { %v3847_v57 = vpop.f32.mrb[16].mxu1 }
 0x1ea   : > { %v961_v58 = vpop.f32.mrb[17].mxu1  ;;  %1058 = vrot.lane.b32.xlu1 %v3847_v57, %s3352_s26 }
 0x1ed   : > { %v3851_v59 = vpop.f32.mrb[18].mxu1 }
 0x1ee   : > { %v966_v61 = vpop.f32.mrb[19].mxu1  ;;  %1060 = vrot.lane.b32.xlu0 %v3851_v59, %s3352_s26 }
 0x1f1   : > { %v3855_v63 = vpop.f32.mrb[20].mxu1 }
 0x1f2   : > { %v971_v7 = vpop.f32.mrb[21].mxu1  ;;  %1062 = vrot.lane.b32.xlu1 %v3855_v63, %s3352_s26 }
 0x1f5   : > { %v3859_v9 = vpop.f32.mrb[22].mxu1 }
 0x1f6   : > { %v976_v10 = vpop.f32.mrb[23].mxu1  ;;  %1064 = vrot.lane.b32.xlu0 %v3859_v9, %s3352_s26 }
 0x1f9   : > { %v3863_v12 = vpop.f32.mrb[24].mxu1 }
 0x1fa   : > { %v981_v13 = vpop.f32.mrb[25].mxu1  ;;  %1066 = vrot.lane.b32.xlu1 %v3863_v12, %s3352_s26 }
 0x1fd   : > { %v3867_v16 = vpop.f32.mrb[26].mxu1 }
 0x1fe   : > { %v986_v17 = vpop.f32.mrb[27].mxu1  ;;  %1068 = vrot.lane.b32.xlu0 %v3867_v16, %s3352_s26 }
 0x201   : > { %v3873_v21 = vpop.f32.mrb[28].mxu1 }
 0x202   : > { %v991_v22 = vpop.f32.mrb[29].mxu1  ;;  %1070 = vrot.lane.b32.xlu1 %v3873_v21, %s3352_s26 }
 0x205   : > { %v3883_v28 = vpop.f32.mrb[30].mxu1 }
 0x206   : > { %v996_v29 = vpop.f32.mrb[31].mxu1  ;;  %1072 = vrot.lane.b32.xlu0 %v3883_v28, %s3352_s26 }
 0x209   : > { %v2988_v31 = vpop.f32.mrb[32].mxu1 }
 0x20a   : > { %v1471_v33 = vadd.f32 %v2988_v31, %v3888_v30  ;;  %v1462_v34 = vpop.f32.mrb[33].mxu1 }
 0x20b   : > { %v1463_v36 = vadd.f32 %v1462_v34, %v3888_v30  ;;  %v2989_v37 = vpop.f32.mrb[34].mxu1 }
 0x20c   : > { %v1474_v38 = vadd.f32 %v2989_v37, %v3888_v30  ;;  %v1465_v40 = vpop.f32.mrb[35].mxu1  ;;  %v1542_v14 = vmax.f32 %v1471_v33, 0.0 }
 0x20d   : > { %v1466_v41 = vadd.f32 %v1465_v40, %v3888_v30  ;;  %v1540_v24 = vmax.f32 %v1463_v36, 0.0 }
 0x20e   : > { %v1543_v20 = vmax.f32 %v1474_v38, 0.0 }
 0x20f   : > { %v1541_v26 = vmax.f32 %v1466_v41, 0.0 }
 0x210   : > { %v3894_v39 = vpack.c.bf16 %v1543_v20, %v1542_v14 }
 0x211   : > { %v3896_v50 = vpack.c.bf16 %v1541_v26, %v1540_v24  ;;  %v2992_v60 = vpop.f32.mrb[36].mxu1 }
 0x212   : > { %v1487_v11 = vadd.f32 %v2992_v60, %v3888_v30  ;;  %v1478_v25 = vpop.f32.mrb[37].mxu1 }
 0x213   : > { %v1479_v43 = vadd.f32 %v1478_v25, %v3888_v30  ;;  %v2993_v45 = vpop.f32.mrb[38].mxu1 }
 0x214   : > { %v1490_v48 = vadd.f32 %v2993_v45, %v3888_v30  ;;  %v1481_v51 = vpop.f32.mrb[39].mxu1  ;;  %v1546_v56 = vmax.f32 %v1487_v11, 0.0 }
 0x215   : > { %v1482_v54 = vadd.f32 %v1481_v51, %v3888_v30  ;;  %v1544_v61 = vmax.f32 %v1479_v43, 0.0 }
 0x216   : > { %v1547_v58 = vmax.f32 %v1490_v48, 0.0 }
 0x217   : > { %v1545_v7 = vmax.f32 %v1482_v54, 0.0 }
 0x218   : > { %v3902_v10 = vpack.c.bf16 %v1547_v58, %v1546_v56 }
 0x219   : > { %v3904_v13 = vpack.c.bf16 %v1545_v7, %v1544_v61  ;;  %v2996_v15 = vpop.f32.mrb[40].mxu1 }
 0x21a   : > { %v1503_v17 = vadd.f32 %v2996_v15, %v3888_v30  ;;  %v1494_v22 = vpop.f32.mrb[41].mxu1 }
 0x21b   : > { %v1495_v23 = vadd.f32 %v1494_v22, %v3888_v30  ;;  %v2997_v29 = vpop.f32.mrb[42].mxu1 }
 0x21c   : > { %v1506_v31 = vadd.f32 %v2997_v29, %v3888_v30  ;;  %v1497_v33 = vpop.f32.mrb[43].mxu1  ;;  %v1550_v36 = vmax.f32 %v1503_v17, 0.0 }
 0x21d   : > { %v1498_v34 = vadd.f32 %v1497_v33, %v3888_v30  ;;  %v1548_v38 = vmax.f32 %v1495_v23, 0.0 }
 0x21e   : > { %v1551_v37 = vmax.f32 %v1506_v31, 0.0  ;;  %v998_v31 = vmul.f32 %v3803_v35, %v3803_v35  ;;  %v1000_v35 = vmul.f32 %v3811_v53, %v3811_v53  ;;  %v3316_v53 = vld [vmem:[%s4558_s3 + $0x18] sm:$0xff]  }
 0x21f   : > { %v1549_v40 = vmax.f32 %v1498_v34, 0.0 }
 0x220   : > { %v3910_v41 = vpack.c.bf16 %v1551_v37, %v1550_v36 }
 0x221   : > { %v3912_v14 = vpack.c.bf16 %v1549_v40, %v1548_v38  ;;  %v3000_v20 = vpop.f32.mrb[44].mxu1  ;;  %v999_v40 = vmul.f32 %v3807_v46, %v3807_v46  ;;  %v3315_v46 = vld [vmem:[%s4558_s3 + $0x10] sm:$0xff]  }
 0x222   : > { %v1519_v24 = vadd.f32 %v3000_v20, %v3888_v30  ;;  %v1510_v26 = vpop.f32.mrb[45].mxu1 }
 0x223   : > { %v1511_v60 = vadd.f32 %v1510_v26, %v3888_v30  ;;  %v3001_v11 = vpop.f32.mrb[46].mxu1 }
 0x224   : > { %v1522_v25 = vadd.f32 %v3001_v11, %v3888_v30  ;;  %v1513_v43 = vpop.f32.mrb[47].mxu1  ;;  %v1554_v48 = vmax.f32 %v1519_v24, 0.0  ;;  %v3314_v24 = vld [vmem:[%s4558_s3 + $0x8] sm:$0xff]  }
 0x225   : > { %v1514_v45 = vadd.f32 %v1513_v43, %v3888_v30  ;;  %v1552_v54 = vmax.f32 %v1511_v60, 0.0 }
 0x226   : > { %v1555_v51 = vmax.f32 %v1522_v25, 0.0 }
 0x227   : > { %v1553_v56 = vmax.f32 %v1514_v45, 0.0 }
 0x228   : > { %v3918_v58 = vpack.c.bf16 %v1555_v51, %v1554_v48 }
 0x229   : > { %v3920_v61 = vpack.c.bf16 %v1553_v56, %v1552_v54  ;;  %v3922_v7 = vpop.f32.mrb[48].mxu1  ;;  %v1002_v54 = vmul.f32 %v3819_v19, %v3819_v19  ;;  %v1004_v19 = vmul.f32 %v3827_v44, %v3827_v44  ;;  %v1006_v44 = vmul.f32 %v3835_v49, %v3835_v49 }
 0x22a   : > { %v1526_v15 = vpop.f32.mrb[49].mxu1  ;;  %v1008_v49 = vmul.f32 %v3843_v55, %v3843_v55  ;;  %v1010_v55 = vmul.f32 %v3851_v59, %v3851_v59  ;;  %v1012_v59 = vmul.f32 %v3859_v9, %v3859_v9  ;;  %v1014_v9 = vmul.f32 %v3867_v16, %v3867_v16 }
 0x22b   : > { %v1527_v17 = vadd.f32 %v1526_v15, %v3888_v30  ;;  %v3005_v22 = vpop.f32.mrb[50].mxu1  ;;  %v1016_v16 = vmul.f32 %v3883_v28, %v3883_v28  ;;  %v4047_v28 = vld [vmem:[%s3454_s16] sm:$0xff] }
 0x22c   : > { %v1529_v23 = vpop.f32.mrb[51].mxu1  ;;  %710 = vrot.lane.b32.xlu1 %v4047_v28, %s3353_s19 }
 0x22d   : > { %v1530_v29 = vadd.f32 %v1529_v23, %v3888_v30  ;;  %v1556_v33 = vmax.f32 %v1527_v17, 0.0  ;;  %v1003_v17 = vmul.f32 %v3823_v42, %v3823_v42  ;;  %v1005_v42 = vmul.f32 %v3831_v47, %v3831_v47 }
 0x22e   : > { %v1007_v47 = vmul.f32 %v3839_v52, %v3839_v52  ;;  %v1009_v52 = vmul.f32 %v3847_v57, %v3847_v57  ;;  %v1011_v57 = vmul.f32 %v3855_v63, %v3855_v63  ;;  %v1013_v63 = vmul.f32 %v3863_v12, %v3863_v12 }
 0x22f   : > { %v1557_v34 = vmax.f32 %v1530_v29, 0.0  ;;  %v1015_v12 = vmul.f32 %v3873_v21, %v3873_v21 }
 0x230   : > { %v1037_v36 = vpop.permute.xlu0 %1036 }
 0x231   : > { %v3928_v37 = vpack.c.bf16 %v1557_v34, %v1556_v33  ;;  %v1093_v38 = vsub.f32 %v998_v31, %v1037_v36 }
 0x233   : > { %v1112_v20 = vmul.f32 0.5, %v1093_v38 }
 0x234   : > { %v1039_v26 = vpop.permute.xlu0 %1038 }
 0x235   : > { %v1094_v60 = vsub.f32 %v999_v40, %v1039_v26  ;;  %2914 = vmatmul.mubr.msk.f32.vlgmr.msra.gmra.mrb[44].mxu0 %vm473_vm1, %v1112_v20 }
 0x236   : > { %3007 = vmatpush3.bf16.msra.mxu0 %v3800_v32  ;;  %2916 = vmatprep.mubr.msk.f32.mxu0 %vm3350_vm0, %v3351_v4  ;;  %v1001_v32 = vmul.f32 %v3815_v8, %v3815_v8 }
 0x237   : > { %v1113_v11 = vmul.f32 0.5, %v1094_v60  ;;  %3008 = vmatprep.subr.bf16.mxu0 %v3314_v24 }
 0x238   : > { %v1041_v25 = vpop.permute.xlu1 %1040 }
 0x239   : > { %v1095_v43 = vsub.f32 %v1000_v35, %v1041_v25  ;;  %2917 = vmatmul.mubr.msk.f32.gmra.mrb[46].mxu0 %vm473_vm1, %v1113_v11 }
 0x23a   : > { %2919 = vmatprep.mubr.msk.f32.mxu0 %vm3350_vm0, %v3351_v4  ;;  %3009 = vmatpush3.bf16.msra.mxu0 %v3314_v24 }
 0x23b   : > { %v1114_v45 = vmul.f32 0.5, %v1095_v43  ;;  %3010 = vmatprep.subr.bf16.mxu0 %v3315_v46 }
 0x23c   : > { %v1043_v48 = vpop.permute.xlu1 %1042 }
 0x23d   : > { %v1096_v51 = vsub.f32 %v1001_v32, %v1043_v48  ;;  %2920 = vmatmul.mubr.msk.f32.gmra.mrb[48].mxu0 %vm473_vm1, %v1114_v45 }
 0x23e   : > { %2922 = vmatprep.mubr.msk.f32.mxu0 %vm3350_vm0, %v3351_v4  ;;  %3011 = vmatpush3.bf16.msra.mxu0 %v3315_v46 }
 0x23f   : > { %v1115_v56 = vmul.f32 0.5, %v1096_v51  ;;  %3012 = vmatprep.subr.bf16.mxu0 %v3316_v53 }
 0x240   : > { %v1045_v8 = vpop.permute.xlu0 %1044 }
 0x241   : > { %v1097_v15 = vsub.f32 %v1002_v54, %v1045_v8  ;;  %2923 = vmatmul.mubr.msk.f32.gmra.mrb[50].mxu0 %vm473_vm1, %v1115_v56 }
 0x242   : > { %2925 = vmatprep.mubr.msk.f32.mxu0 %vm3350_vm0, %v3351_v4  ;;  %3013 = vmatpush3.bf16.msra.mxu0 %v3316_v53 }
 0x243   : > { %v1116_v22 = vmul.f32 0.5, %v1097_v15  ;;  %3248 = vmatprep.subr.bf16.mxu0 %v3349_v2 }
 0x244   : > { %v1047_v23 = vpop.permute.xlu1 %1046 }
 0x245   : > { %v1098_v29 = vsub.f32 %v1003_v17, %v1047_v23  ;;  %2926 = vmatmul.mubr.msk.f32.gmra.mrb[52].mxu0 %vm473_vm1, %v1116_v22 }
 0x246   : > { %2928 = vmatprep.mubr.msk.f32.mxu0 %vm3350_vm0, %v3351_v4 }
 0x247   : > { %v1117_v31 = vmul.f32 0.5, %v1098_v29 }
 0x248   : > { %v1049_v33 = vpop.permute.xlu0 %1048 }
 0x249   : > { %v1099_v34 = vsub.f32 %v1004_v19, %v1049_v33  ;;  %2929 = vmatmul.mubr.msk.f32.gmra.mrb[54].mxu0 %vm473_vm1, %v1117_v31 }
 0x24a   : > { %2931 = vmatprep.mubr.msk.f32.mxu0 %vm3350_vm0, %v3351_v4 }
 0x24b   : > { %v1118_v36 = vmul.f32 0.5, %v1099_v34 }
 0x24c   : > { %v1051_v38 = vpop.permute.xlu1 %1050 }
 0x24d   : > { %v1100_v40 = vsub.f32 %v1005_v42, %v1051_v38  ;;  %2932 = vmatmul.mubr.msk.f32.gmra.mrb[56].mxu0 %vm473_vm1, %v1118_v36 }
 0x24e   : > { %2934 = vmatprep.mubr.msk.f32.mxu0 %vm3350_vm0, %v3351_v4 }
 0x24f   : > { %v1119_v20 = vmul.f32 0.5, %v1100_v40 }
 0x250   : > { %v1053_v24 = vpop.permute.xlu0 %1052 }
 0x251   : > { %v1101_v26 = vsub.f32 %v1006_v44, %v1053_v24  ;;  %2935 = vmatmul.mubr.msk.f32.gmra.mrb[58].mxu0 %vm473_vm1, %v1119_v20 }
 0x252   : > { %2937 = vmatprep.mubr.msk.f32.mxu0 %vm3350_vm0, %v3351_v4 }
 0x253   : > { %v1120_v60 = vmul.f32 0.5, %v1101_v26  ;;  %v4101_v26 = vld [vmem:[%s3454_s16 + $0x48] sm:$0xff] }
 0x254   : > { %v1055_v35 = vpop.permute.xlu1 %1054 }
 0x255   : > { %v1102_v11 = vsub.f32 %v1007_v47, %v1055_v35  ;;  %2938 = vmatmul.mubr.msk.f32.gmra.mrb[60].mxu0 %vm473_vm1, %v1120_v60  ;;  %v4106_v47 = vld [vmem:[%s3454_s16 + $0x50] sm:$0xff]  ;;  %v4111_v60 = vld [vmem:[%s3454_s16 + $0x58] sm:$0xff]  ;;  %v4116_v35 = vld [vmem:[%s3454_s16 + $0x60] sm:$0xff] }
 0x256   : > { %2940 = vmatprep.mubr.msk.f32.mxu0 %vm3350_vm0, %v3351_v4 }
 0x257   : > { %v1121_v46 = vmul.f32 0.5, %v1102_v11  ;;  %v3317_v11 = vld [vmem:[%s4559_s4] sm:$0xff]  }
 0x258   : > { %v1057_v25 = vpop.permute.xlu0 %1056  ;;  %3034 = vmatprep.subr.bf16.mxu1 %v3317_v11 }
 0x259   : > { %v1103_v43 = vsub.f32 %v1008_v49, %v1057_v25  ;;  %2941 = vmatmul.mubr.msk.f32.gmra.mrb[62].mxu0 %vm473_vm1, %v1121_v46  ;;  %3035 = vmatpush3.bf16.msra.mxu1 %v3317_v11 }
 0x25a   : > { %2943 = vmatprep.mubr.msk.f32.mxu0 %vm3350_vm0, %v3351_v4 }
 0x25b   : > { %v1122_v32 = vmul.f32 0.5, %v1103_v43 }
 0x25c   : > { %v1059_v45 = vpop.permute.xlu1 %1058 }
 0x25d   : > { %v1104_v53 = vsub.f32 %v1009_v52, %v1059_v45  ;;  %2944 = vmatmul.mubr.msk.f32.gmra.mrb[64].mxu0 %vm473_vm1, %v1122_v32 }
 0x25e   : > { %2946 = vmatprep.mubr.msk.f32.mxu0 %vm3350_vm0, %v3351_v4 }
 0x25f   : > { %v1123_v48 = vmul.f32 0.5, %v1104_v53 }
 0x260   : > { %v1061_v51 = vpop.permute.xlu0 %1060 }
 0x261   : > { %v1105_v54 = vsub.f32 %v1010_v55, %v1061_v51  ;;  %2947 = vmatmul.mubr.msk.f32.gmra.mrb[66].mxu0 %vm473_vm1, %v1123_v48 }
 0x262   : > { %2949 = vmatprep.mubr.msk.f32.mxu0 %vm3350_vm0, %v3351_v4 }
 0x263   : > { %v1124_v56 = vmul.f32 0.5, %v1105_v54 }
 0x264   : > { %v1063_v8 = vpop.permute.xlu1 %1062 }
 0x265   : > { %v1106_v15 = vsub.f32 %v1011_v57, %v1063_v8  ;;  %2950 = vmatmul.mubr.msk.f32.gmra.mrb[68].mxu0 %vm473_vm1, %v1124_v56 }
 0x266   : > { %2952 = vmatprep.mubr.msk.f32.mxu0 %vm3350_vm0, %v3351_v4 }
 0x267   : > { %v1125_v17 = vmul.f32 0.5, %v1106_v15 }
 0x268   : > { %v1065_v22 = vpop.permute.xlu0 %1064 }
 0x269   : > { %v1107_v23 = vsub.f32 %v1012_v59, %v1065_v22  ;;  %2953 = vmatmul.mubr.msk.f32.gmra.mrb[70].mxu0 %vm473_vm1, %v1125_v17 }
 0x26a   : > { %2955 = vmatprep.mubr.msk.f32.mxu0 %vm3350_vm0, %v3351_v4 }
 0x26b   : > { %v1126_v29 = vmul.f32 0.5, %v1107_v23 }
 0x26c   : > { %v1067_v19 = vpop.permute.xlu1 %1066 }
 0x26d   : > { %v1108_v31 = vsub.f32 %v1013_v63, %v1067_v19  ;;  %2956 = vmatmul.mubr.msk.f32.gmra.mrb[72].mxu0 %vm473_vm1, %v1126_v29 }
 0x26e   : > { %2958 = vmatprep.mubr.msk.f32.mxu0 %vm3350_vm0, %v3351_v4 }
 0x26f   : > { %v1127_v33 = vmul.f32 0.5, %v1108_v31 }
 0x270   : > { %v1069_v34 = vpop.permute.xlu0 %1068 }
 0x271   : > { %v1109_v42 = vsub.f32 %v1014_v9, %v1069_v34  ;;  %2959 = vmatmul.mubr.msk.f32.gmra.mrb[74].mxu0 %vm473_vm1, %v1127_v33 }
 0x272   : > { %2961 = vmatprep.mubr.msk.f32.mxu0 %vm3350_vm0, %v3351_v4 }
 0x273   : > { %v1128_v36 = vmul.f32 0.5, %v1109_v42 }
 0x274   : > { %v1071_v38 = vpop.permute.xlu1 %1070 }
 0x275   : > { %v1110_v40 = vsub.f32 %v1015_v12, %v1071_v38  ;;  %2962 = vmatmul.mubr.msk.f32.gmra.mrb[76].mxu0 %vm473_vm1, %v1128_v36 }
 0x276   : > { %2964 = vmatprep.mubr.msk.f32.mxu0 %vm3350_vm0, %v3351_v4 }
 0x277   : > { %v1129_v44 = vmul.f32 0.5, %v1110_v40 }
 0x278   : > { %v1073_v20 = vpop.permute.xlu0 %1072 }
 0x279   : > { %v1111_v24 = vsub.f32 %v1016_v16, %v1073_v20  ;;  %2965 = vmatmul.mubr.msk.f32.gmra.mrb[78].mxu0 %vm473_vm1, %v1129_v44  ;;  %v1579_v44 = vsub.s32 1, %v3871_v18  ;;  %v1974_v20 = vld [vmem:[%s4565_s10] sm:$0xff] }
 0x27a   : > { %2967 = vmatprep.mubr.msk.f32.mxu0 %vm3350_vm0, %v3351_v4 }
 0x27b   : > { %v1130_v21 = vmul.f32 0.5, %v1111_v24  ;;  %v1975_v24 = vld [vmem:[%s4565_s10 + $0x8] sm:$0xff] }
 0x27d   : > { %2968 = vmatmul.mubr.msk.f32.gmra.mrb[80].mxu0 %vm473_vm1, %v1130_v21  ;;  %v1976_v21 = vld [vmem:[%s4565_s10 + $0x10] sm:$0xff] }
 0x27e   : > { %3014 = vmatprep.mubr.msk.bf16.mxu0 %vm1605_vm2, %v3896_v50  ;;  %v4057_v50 = vld [vmem:[%s3454_s16 + $0x10] sm:$0xff] }
 0x27f   : > { %714 = vrot.lane.b32.xlu1 %v4057_v50, %s3353_s19 }
 0x281   : > { %3015 = vmatmul.mubr.msk.bf16.vlgmr.msra.gmra.mrb[84].mxu0 %vm1605_vm2, %v3894_v39  ;;  %v4052_v39 = vld [vmem:[%s3454_s16 + $0x8] sm:$0xff] }
 0x282   : > { %3018 = vmatprep.mubr.msk.bf16.mxu0 %vm1605_vm2, %v3904_v13  ;;  %712 = vrot.lane.b32.xlu0 %v4052_v39, %s3353_s19  ;;  %v4064_v13 = vld [vmem:[%s3454_s16 + $0x18] sm:$0xff] }
 0x286   : > { %716 = vrot.lane.b32.xlu0 %v4064_v13, %s3353_s19 }
 0x289   : > { %3019 = vmatmul.mubr.msk.bf16.gmra.mrb[88].mxu0 %vm1605_vm2, %v3902_v10  ;;  %v1535_v10 = vadd.f32 %v3922_v7, %v3888_v30  ;;  %v4088_v7 = vld [vmem:[%s3454_s16 + $0x38] sm:$0xff] }
 0x28a   : > { %3022 = vmatprep.mubr.msk.bf16.mxu0 %vm1605_vm2, %v3912_v14  ;;  %v4078_v14 = vld [vmem:[%s3454_s16 + $0x28] sm:$0xff] }
 0x28b   : > { %v1558_v30 = vmax.f32 %v1535_v10, 0.0  ;;  %720 = vrot.lane.b32.xlu0 %v4078_v14, %s3353_s19 }
 0x28f   : > { %724 = vrot.lane.b32.xlu0 %v4088_v7, %s3353_s19 }
 0x291   : > { %3023 = vmatmul.mubr.msk.bf16.gmra.mrb[92].mxu0 %vm1605_vm2, %v3910_v41  ;;  %v4073_v41 = vld [vmem:[%s3454_s16 + $0x20] sm:$0xff] }
 0x292   : > { %3026 = vmatprep.mubr.msk.bf16.mxu0 %vm1605_vm2, %v3920_v61  ;;  %718 = vrot.lane.b32.xlu1 %v4073_v41, %s3353_s19  ;;  %v4083_v61 = vld [vmem:[%s3454_s16 + $0x30] sm:$0xff] }
 0x293   : > { %728 = vrot.lane.b32.xlu0 %v4101_v26, %s3353_s19 }
 0x296   : > { %722 = vrot.lane.b32.xlu1 %v4083_v61, %s3353_s19 }
 0x297   : > { %732 = vrot.lane.b32.xlu0 %v4111_v60, %s3353_s19 }
 0x299   : > { %3027 = vmatmul.mubr.msk.bf16.gmra.mrb[96].mxu0 %vm1605_vm2, %v3918_v58  ;;  %v1568_v58 = vpack.c.bf16 %v1558_v30, %v1558_v30  ;;  %v3249_v30 = vpack.c.bf16 %v1975_v24, %v1974_v20 }
 0x29a   : > { %3030 = vmatprep.mubr.msk.bf16.mxu0 %vm1605_vm2, %v3928_v37  ;;  %v4094_v37 = vld [vmem:[%s3454_s16 + $0x40] sm:$0xff] }
 0x29b   : > { %726 = vrot.lane.b32.xlu1 %v4094_v37, %s3353_s19  ;;  %736 = vrot.lane.b32.xlu0 %v3612_v62, %s3353_s19  ;;  %v3318_v62 = vld [vmem:[%s4559_s4 + $0x8] sm:$0xff]  }
 0x29c   : > { %3036 = vmatprep.subr.bf16.mxu1 %v3318_v62  ;;  %3250 = vmatpush3.bf16.msra.mxu0 %v3249_v30  ;;  %v786_v30 = vld [vmem:[%s4563_s8] sm:$0xff] }
 0x29d   : > { %3037 = vmatpush3.bf16.msra.mxu1 %v3318_v62  ;;  %v4197_v62 = vrot.slane %v3881_v27, %v1579_v44  ;;  %3251 = vmatprep.subr.bf16.mxu0 %v3349_v2 }
 0x29f   : > { %730 = vrot.lane.b32.xlu1 %v4106_v47, %s3353_s19  ;;  %740 = vrot.lane.b32.xlu0 %v3629_v1, %s3353_s19  ;;  %v3320_v1 = vld [vmem:[%s4559_s4 + $0x18] sm:$0xff]  }
 0x2a1   : > { %3031 = vmatmul.mubr.msk.bf16.gmra.mrb[100].mxu0 %vm1605_vm2, %v1568_v58  ;;  %v1977_v58 = vld [vmem:[%s4565_s10 + $0x18] sm:$0xff] }
 0x2a2   : > { %3078 = vmatprep.mubr.msk.f32.mxu0 %vm3350_vm0, %v3351_v4 }
 0x2a3   : > { %734 = vrot.lane.b32.xlu1 %v4116_v35, %s3353_s19  ;;  %744 = vrot.lane.b32.xlu0 %v3644_v5, %s3353_s19 }
 0x2a7   : > { %738 = vrot.lane.b32.xlu1 %v3621_v0, %s3353_s19  ;;  %v3319_v0 = vld [vmem:[%s4559_s4 + $0x10] sm:$0xff]  }
 0x2a8   : > { %3038 = vmatprep.subr.bf16.mxu1 %v3319_v0 }
 0x2a9   : > { %3039 = vmatpush3.bf16.msra.mxu1 %v3319_v0  ;;  %v3252_v0 = vpack.c.bf16 %v1977_v58, %v1976_v21 }
 0x2aa   : > { %3040 = vmatprep.subr.bf16.mxu1 %v3320_v1 }
 0x2ab   : > { %742 = vrot.lane.b32.xlu1 %v3637_v3, %s3353_s19  ;;  %3253 = vmatpush3.bf16.msra.mxu0 %v3252_v0 }
 0x2ac   : > { %3254 = vmatprep.subr.bf16.mxu0 %v3349_v2 }
 0x2ad   : > { %3041 = vmatpush3.bf16.msra.mxu1 %v3320_v1  ;;  %v1978_v1 = vld [vmem:[%s4565_s10 + $0x20] sm:$0xff] }
 0x2ae   : > { %3135 = vmatprep.subr.mxu1 %v3351_v4 }
 0x2af   : > { %746 = vrot.lane.b32.xlu1 %v3651_v6, %s3353_s19  ;;  %s4475_s19 = scalar_lea.vmem %s4566_s11, %s2552_s13 }
 0x308   : > { %v4145_v3 = vpop.f32.mrb[44].mxu0 }
 0x309   : > { %v2915_v5 = vpop.f32.mrb[45].mxu0 }
 0x30a   : > { %v1979_v5 = vld [vmem:[%s4565_s10 + $0x28] sm:$0xff] }
 0x30c   : > { %v4147_v6 = vpop.f32.mrb[46].mxu0 }
 0x30d   : > { %v2918_v49 = vpop.f32.mrb[47].mxu0 }
 0x310   : > { %v4149_v46 = vpop.f32.mrb[48].mxu0 }
 0x311   : > { %v2921_v25 = vpop.f32.mrb[49].mxu0 }
 0x314   : > { %v4151_v43 = vpop.f32.mrb[50].mxu0 }
 0x315   : > { %v2924_v52 = vpop.f32.mrb[51].mxu0 }
 0x318   : > { %v4153_v32 = vpop.f32.mrb[52].mxu0 }
 0x319   : > { %v2927_v45 = vpop.f32.mrb[53].mxu0 }
 0x31c   : > { %v4155_v53 = vpop.f32.mrb[54].mxu0 }
 0x31d   : > { %v2930_v55 = vpop.f32.mrb[55].mxu0 }
 0x320   : > { %v4157_v48 = vpop.f32.mrb[56].mxu0 }
 0x321   : > { %v2933_v51 = vpop.f32.mrb[57].mxu0 }
 0x322   : > { %v3255_v51 = vpack.c.bf16 %v1979_v5, %v1978_v1 }
 0x324   : > { %v4159_v54 = vpop.f32.mrb[58].mxu0  ;;  %3256 = vmatpush3.bf16.msra.mxu0 %v3255_v51 }
 0x325   : > { %v2936_v57 = vpop.f32.mrb[59].mxu0  ;;  %3257 = vmatprep.subr.bf16.mxu0 %v3349_v2 }
 0x328   : > { %v4161_v56 = vpop.f32.mrb[60].mxu0 }
 0x329   : > { %v2939_v8 = vpop.f32.mrb[61].mxu0 }
 0x32c   : > { %v4163_v15 = vpop.f32.mrb[62].mxu0 }
 0x32d   : > { %v2942_v59 = vpop.f32.mrb[63].mxu0 }
 0x32e   : > { %v1980_v59 = vld [vmem:[%s4565_s10 + $0x30] sm:$0xff] }
 0x330   : > { %v4165_v17 = vpop.f32.mrb[64].mxu0 }
 0x331   : > { %v2945_v22 = vpop.f32.mrb[65].mxu0 }
 0x332   : > { %v1981_v22 = vld [vmem:[%s4565_s10 + $0x38] sm:$0xff] }
 0x334   : > { %v4167_v23 = vpop.f32.mrb[66].mxu0 }
 0x335   : > { %v2948_v63 = vpop.f32.mrb[67].mxu0 }
 0x338   : > { %v4169_v29 = vpop.f32.mrb[68].mxu0 }
 0x339   : > { %v2951_v19 = vpop.f32.mrb[69].mxu0 }
 0x33c   : > { %v4171_v31 = vpop.f32.mrb[70].mxu0 }
 0x33d   : > { %v2954_v9 = vpop.f32.mrb[71].mxu0 }
 0x340   : > { %v4173_v33 = vpop.f32.mrb[72].mxu0 }
 0x341   : > { %v2957_v34 = vpop.f32.mrb[73].mxu0 }
 0x344   : > { %v4175_v42 = vpop.f32.mrb[74].mxu0 }
 0x345   : > { %v2960_v12 = vpop.f32.mrb[75].mxu0 }
 0x348   : > { %v4177_v36 = vpop.f32.mrb[76].mxu0 }
 0x349   : > { %v2963_v38 = vpop.f32.mrb[77].mxu0 }
 0x34a   : > { %v3258_v38 = vpack.c.bf16 %v1981_v22, %v1980_v59 }
 0x34c   : > { %v4179_v40 = vpop.f32.mrb[78].mxu0  ;;  %3259 = vmatpush3.bf16.msra.mxu0 %v3258_v38 }
 0x34d   : > { %v2966_v16 = vpop.f32.mrb[79].mxu0 }
 0x350   : > { %v4191_v10 = vpop.f32.mrb[80].mxu0 }
 0x351   : > { %v2969_v11 = vpop.f32.mrb[81].mxu0 }
 0x354   : > { %v3016_v49 = vpop.f32.mrb[84].mxu0 }
 0x355   : > { %v1679_v25 = vadd.f32 %v3016_v49, %v4197_v62  ;;  %v1670_v52 = vpop.f32.mrb[85].mxu0 }
 0x356   : > { %v1671_v45 = vadd.f32 %v1670_v52, %v4197_v62  ;;  %v3017_v55 = vpop.f32.mrb[86].mxu0 }
 0x357   : > { %v1682_v57 = vadd.f32 %v3017_v55, %v4197_v62  ;;  %v1673_v8 = vpop.f32.mrb[87].mxu0  ;;  %v1750_v19 = vmax.f32 %v1679_v25, 0.0 }
 0x358   : > { %v1674_v63 = vadd.f32 %v1673_v8, %v4197_v62  ;;  %v1748_v34 = vmax.f32 %v1671_v45, 0.0 }
 0x359   : > { %v1751_v9 = vmax.f32 %v1682_v57, 0.0 }
 0x35a   : > { %v1749_v12 = vmax.f32 %v1674_v63, 0.0 }
 0x35b   : > { %v1768_v16 = vpack.c.bf16 %v1751_v9, %v1750_v19 }
 0x35c   : > { %v1767_v44 = vpack.c.bf16 %v1749_v12, %v1748_v34  ;;  %v3020_v20 = vpop.f32.mrb[88].mxu0 }
 0x35d   : > { %v1695_v24 = vadd.f32 %v3020_v20, %v4197_v62  ;;  %v1686_v21 = vpop.f32.mrb[89].mxu0 }
 0x35e   : > { %v1687_v58 = vadd.f32 %v1686_v21, %v4197_v62  ;;  %v3021_v11 = vpop.f32.mrb[90].mxu0  ;;  %3042 = vmatprep.mubr.msk.bf16.mxu1 %vm1605_vm2, %v1767_v44 }
 0x35f   : > { %v1698_v0 = vadd.f32 %v3021_v11, %v4197_v62  ;;  %v1689_v1 = vpop.f32.mrb[91].mxu0  ;;  %3043 = vmatmul.mubr.msk.bf16.vlgmr.msra.gmra.mrb[52].mxu1 %vm1605_vm2, %v1768_v16  ;;  %v1754_v5 = vmax.f32 %v1695_v24, 0.0 }
 0x360   : > { %v1690_v2 = vadd.f32 %v1689_v1, %v4197_v62  ;;  %3136 = vmatpush3.msra.mxu1 %v786_v30  ;;  %v1752_v25 = vmax.f32 %v1687_v58, 0.0 }
 0x361   : > { %v1755_v49 = vmax.f32 %v1698_v0, 0.0 }
 0x362   : > { %v1753_v52 = vmax.f32 %v1690_v2, 0.0 }
 0x363   : > { %v1770_v45 = vpack.c.bf16 %v1755_v49, %v1754_v5 }
 0x364   : > { %v1769_v55 = vpack.c.bf16 %v1753_v52, %v1752_v25  ;;  %v3024_v51 = vpop.f32.mrb[92].mxu0 }
 0x365   : > { %v1711_v57 = vadd.f32 %v3024_v51, %v4197_v62  ;;  %v1702_v8 = vpop.f32.mrb[93].mxu0 }
 0x366   : > { %v1703_v59 = vadd.f32 %v1702_v8, %v4197_v62  ;;  %v3025_v22 = vpop.f32.mrb[94].mxu0  ;;  %3046 = vmatprep.mubr.msk.bf16.mxu1 %vm1605_vm2, %v1769_v55 }
 0x367   : > { %v1714_v63 = vadd.f32 %v3025_v22, %v4197_v62  ;;  %v1705_v19 = vpop.f32.mrb[95].mxu0  ;;  %3047 = vmatmul.mubr.msk.bf16.gmra.mrb[56].mxu1 %vm1605_vm2, %v1770_v45  ;;  %v1758_v34 = vmax.f32 %v1711_v57, 0.0 }
 0x368   : > { %v1706_v9 = vadd.f32 %v1705_v19, %v4197_v62  ;;  %v1756_v38 = vmax.f32 %v1703_v59, 0.0 }
 0x369   : > { %v1759_v12 = vmax.f32 %v1714_v63, 0.0 }
 0x36a   : > { %v1757_v16 = vmax.f32 %v1706_v9, 0.0 }
 0x36b   : > { %v1772_v44 = vpack.c.bf16 %v1759_v12, %v1758_v34 }
 0x36c   : > { %v1771_v20 = vpack.c.bf16 %v1757_v16, %v1756_v38  ;;  %v3028_v24 = vpop.f32.mrb[96].mxu0 }
 0x36d   : > { %v1727_v21 = vadd.f32 %v3028_v24, %v4197_v62  ;;  %v1718_v30 = vpop.f32.mrb[97].mxu0  ;;  %v713_v24 = vpop.permute.xlu0 %712 }
 0x36e   : > { %v1719_v58 = vadd.f32 %v1718_v30, %v4197_v62  ;;  %v3029_v11 = vpop.f32.mrb[98].mxu0  ;;  %3050 = vmatprep.mubr.msk.bf16.mxu1 %vm1605_vm2, %v1771_v20 }
 0x36f   : > { %v1730_v0 = vadd.f32 %v3029_v11, %v4197_v62  ;;  %v1721_v1 = vpop.f32.mrb[99].mxu0  ;;  %3051 = vmatmul.mubr.msk.bf16.gmra.mrb[60].mxu1 %vm1605_vm2, %v1772_v44  ;;  %v1762_v5 = vmax.f32 %v1727_v21, 0.0  ;;  %v711_v44 = vpop.permute.xlu1 %710 }
 0x370   : > { %v1722_v2 = vadd.f32 %v1721_v1, %v4197_v62  ;;  %v1760_v25 = vmax.f32 %v1719_v58, 0.0  ;;  %v767_v20 = vmul.f32 %v4047_v28, %v711_v44  ;;  %v3339_v44 = vld [vmem:[%s3454_s16 + $0x90] sm:$0xff] }
 0x371   : > { %v1763_v49 = vmax.f32 %v1730_v0, 0.0  ;;  %v717_v58 = vpop.permute.xlu0 %716 }
 0x372   : > { %v1761_v52 = vmax.f32 %v1722_v2, 0.0  ;;  %v770_v28 = vmul.f32 %v4064_v13, %v717_v58 }
 0x373   : > { %v1774_v45 = vpack.c.bf16 %v1763_v49, %v1762_v5  ;;  %v715_v21 = vpop.permute.xlu1 %714 }
 0x374   : > { %v1773_v55 = vpack.c.bf16 %v1761_v52, %v1760_v25  ;;  %v3032_v51 = vpop.f32.mrb[100].mxu0  ;;  %v769_v30 = vmul.f32 %v4057_v50, %v715_v21 }
 0x375   : > { %v1743_v57 = vadd.f32 %v3032_v51, %v4197_v62  ;;  %v1734_v8 = vpop.f32.mrb[101].mxu0  ;;  %v721_v50 = vpop.permute.xlu0 %720 }
 0x376   : > { %v1735_v59 = vadd.f32 %v1734_v8, %v4197_v62  ;;  %v3033_v22 = vpop.f32.mrb[102].mxu0  ;;  %3054 = vmatprep.mubr.msk.bf16.mxu1 %vm1605_vm2, %v1773_v55  ;;  %v772_v0 = vmul.f32 %v4078_v14, %v721_v50  ;;  %v3334_v55 = vld [vmem:[%s3454_s16 + $0x68] sm:$0xff] }
 0x377   : > { %v1737_v63 = vpop.f32.mrb[103].mxu0  ;;  %3055 = vmatmul.mubr.msk.bf16.gmra.mrb[64].mxu1 %vm1605_vm2, %v1774_v45  ;;  %v1766_v9 = vmax.f32 %v1743_v57, 0.0  ;;  %v3335_v57 = vld [vmem:[%s3454_s16 + $0x70] sm:$0xff] }
 0x378   : > { %v1738_v19 = vadd.f32 %v1737_v63, %v4197_v62  ;;  %v1764_v34 = vmax.f32 %v1735_v59, 0.0  ;;  %v768_v62 = vmul.f32 %v4052_v39, %v713_v24  ;;  %v719_v39 = vpop.permute.xlu1 %718  ;;  %v3336_v59 = vld [vmem:[%s3454_s16 + $0x78] sm:$0xff]  ;;  %v1787_v24 = vsub.s32 2, %v3871_v18 }
 0x379   : > { %v1776_v16 = vpack.c.bf16 %v1766_v9, %v1766_v9  ;;  %v771_v11 = vmul.f32 %v4073_v41, %v719_v39  ;;  %v725_v41 = vpop.permute.xlu0 %724 }
 0x37a   : > { %v1765_v12 = vmax.f32 %v1738_v19, 0.0  ;;  %v774_v2 = vmul.f32 %v4088_v7, %v725_v41  ;;  %v3337_v19 = vld [vmem:[%s3454_s16 + $0x80] sm:$0xff] }
 0x37c   : > { %v1775_v38 = vpack.c.bf16 %v1765_v12, %v1764_v34  ;;  %v723_v13 = vpop.permute.xlu1 %722  ;;  %v3338_v12 = vld [vmem:[%s3454_s16 + $0x88] sm:$0xff] }
 0x37d   : > { %v773_v1 = vmul.f32 %v4083_v61, %v723_v13  ;;  %v729_v61 = vpop.permute.xlu0 %728 }
 0x37e   : > { %3058 = vmatprep.mubr.msk.bf16.mxu1 %vm1605_vm2, %v1775_v38  ;;  %v776_v49 = vmul.f32 %v4101_v26, %v729_v61 }
 0x37f   : > { %3059 = vmatmul.mubr.msk.bf16.gmra.mrb[68].mxu1 %vm1605_vm2, %v1776_v16 }
 0x380   : > { %3137 = vmatprep.mubr.msk.f32.mxu1 %vm3350_vm0, %v3351_v4  ;;  %v727_v14 = vpop.permute.xlu1 %726 }
 0x381   : > { %v775_v5 = vmul.f32 %v4094_v37, %v727_v14  ;;  %v733_v37 = vpop.permute.xlu0 %732 }
 0x382   : > { %v778_v52 = vmul.f32 %v4111_v60, %v733_v37 }
 0x384   : > { %v731_v7 = vpop.permute.xlu1 %730 }
 0x385   : > { %v777_v25 = vmul.f32 %v4106_v47, %v731_v7  ;;  %v737_v47 = vpop.permute.xlu0 %736 }
 0x386   : > { %v780_v51 = vmul.f32 %v3334_v55, %v737_v47 }
 0x387   : > { %3138 = vmatmul.mubr.msk.f32.vlgmr.msra.gmra.mrb[72].mxu1 %vm2199_vm3, %v767_v20 }
 0x388   : > { %3140 = vmatprep.mubr.msk.f32.mxu1 %vm3350_vm0, %v3351_v4  ;;  %v735_v26 = vpop.permute.xlu1 %734 }
 0x389   : > { %v779_v45 = vmul.f32 %v4116_v35, %v735_v26  ;;  %v741_v35 = vpop.permute.xlu0 %740 }
 0x38a   : > { %v782_v22 = vmul.f32 %v3336_v59, %v741_v35 }
 0x38b   : > { %3141 = vmatmul.mubr.msk.f32.gmra.mrb[74].mxu1 %vm2199_vm3, %v768_v62  ;;  %v4324_v62 = vrot.slane %v3881_v27, %v1787_v24 }
 0x38c   : > { %3143 = vmatprep.mubr.msk.f32.mxu1 %vm3350_vm0, %v3351_v4  ;;  %v739_v60 = vpop.permute.xlu1 %738 }
 0x38d   : > { %v781_v8 = vmul.f32 %v3335_v57, %v739_v60  ;;  %v745_v34 = vpop.permute.xlu0 %744 }
 0x38e   : > { %v784_v38 = vmul.f32 %v3338_v12, %v745_v34 }
 0x38f   : > { %3144 = vmatmul.mubr.msk.f32.gmra.mrb[76].mxu1 %vm2199_vm3, %v769_v30 }
 0x390   : > { %3146 = vmatprep.mubr.msk.f32.mxu1 %vm3350_vm0, %v3351_v4  ;;  %v743_v63 = vpop.permute.xlu1 %742 }
 0x391   : > { %v783_v9 = vmul.f32 %v3337_v19, %v743_v63 }
 0x393   : > { %3147 = vmatmul.mubr.msk.f32.gmra.mrb[78].mxu1 %vm2199_vm3, %v770_v28 }
 0x394   : > { %3149 = vmatprep.mubr.msk.f32.mxu1 %vm3350_vm0, %v3351_v4  ;;  %v747_v16 = vpop.permute.xlu1 %746 }
 0x395   : > { %v785_v20 = vmul.f32 %v3339_v44, %v747_v16 }
 0x397   : > { %3150 = vmatmul.mubr.msk.f32.gmra.mrb[80].mxu1 %vm2199_vm3, %v771_v11 }
 0x398   : > { %3152 = vmatprep.mubr.msk.f32.mxu1 %vm3350_vm0, %v3351_v4 }
 0x39b   : > { %3153 = vmatmul.mubr.msk.f32.gmra.mrb[82].mxu1 %vm2199_vm3, %v772_v0 }
 0x39c   : > { %3155 = vmatprep.mubr.msk.f32.mxu1 %vm3350_vm0, %v3351_v4 }
 0x39f   : > { %3156 = vmatmul.mubr.msk.f32.gmra.mrb[84].mxu1 %vm2199_vm3, %v773_v1 }
 0x3a0   : > { %3158 = vmatprep.mubr.msk.f32.mxu1 %vm3350_vm0, %v3351_v4 }
 0x3a3   : > { %3159 = vmatmul.mubr.msk.f32.gmra.mrb[86].mxu1 %vm2199_vm3, %v774_v2 }
 0x3a4   : > { %3161 = vmatprep.mubr.msk.f32.mxu1 %vm3350_vm0, %v3351_v4 }
 0x3a7   : > { %3162 = vmatmul.mubr.msk.f32.gmra.mrb[88].mxu1 %vm2199_vm3, %v775_v5 }
 0x3a8   : > { %3164 = vmatprep.mubr.msk.f32.mxu1 %vm3350_vm0, %v3351_v4 }
 0x3ab   : > { %3165 = vmatmul.mubr.msk.f32.gmra.mrb[90].mxu1 %vm2199_vm3, %v776_v49 }
 0x3ac   : > { %3167 = vmatprep.mubr.msk.f32.mxu1 %vm3350_vm0, %v3351_v4 }
 0x3af   : > { %3168 = vmatmul.mubr.msk.f32.gmra.mrb[92].mxu1 %vm2199_vm3, %v777_v25 }
 0x3b0   : > { %3170 = vmatprep.mubr.msk.f32.mxu1 %vm3350_vm0, %v3351_v4 }
 0x3b3   : > { %3171 = vmatmul.mubr.msk.f32.gmra.mrb[94].mxu1 %vm2199_vm3, %v778_v52 }
 0x3b4   : > { %3173 = vmatprep.mubr.msk.f32.mxu1 %vm3350_vm0, %v3351_v4 }
 0x3b7   : > { %3174 = vmatmul.mubr.msk.f32.gmra.mrb[96].mxu1 %vm2199_vm3, %v779_v45 }
 0x3b8   : > { %3176 = vmatprep.mubr.msk.f32.mxu1 %vm3350_vm0, %v3351_v4 }
 0x3bb   : > { %3177 = vmatmul.mubr.msk.f32.gmra.mrb[98].mxu1 %vm2199_vm3, %v780_v51 }
 0x3bc   : > { %3179 = vmatprep.mubr.msk.f32.mxu1 %vm3350_vm0, %v3351_v4 }
 0x3bf   : > { %3180 = vmatmul.mubr.msk.f32.gmra.mrb[100].mxu1 %vm2199_vm3, %v781_v8 }
 0x3c0   : > { %3182 = vmatprep.mubr.msk.f32.mxu1 %vm3350_vm0, %v3351_v4 }
 0x3c3   : > { %3183 = vmatmul.mubr.msk.f32.gmra.mrb[102].mxu1 %vm2199_vm3, %v782_v22 }
 0x3c4   : > { %3185 = vmatprep.mubr.msk.f32.mxu1 %vm3350_vm0, %v3351_v4 }
 0x3c7   : > { %3186 = vmatmul.mubr.msk.f32.gmra.mrb[104].mxu1 %vm2199_vm3, %v783_v9 }
 0x3c8   : > { %3188 = vmatprep.mubr.msk.f32.mxu1 %vm3350_vm0, %v3351_v4 }
 0x3cb   : > { %3189 = vmatmul.mubr.msk.f32.gmra.mrb[106].mxu1 %vm2199_vm3, %v784_v38 }
 0x3cc   : > { %3191 = vmatprep.mubr.msk.f32.mxu1 %vm3350_vm0, %v3351_v4 }
 0x3cf   : > { %3192 = vmatmul.mubr.msk.f32.gmra.mrb[108].mxu1 %vm2199_vm3, %v785_v20 }
 0x432   : > { %v3044_v21 = vpop.f32.mrb[52].mxu1 }
 0x433   : > { %v1877_v30 = vpop.f32.mrb[53].mxu1  ;;  %v1886_v0 = vadd.f32 %v3044_v21, %v4324_v62 }
 0x434   : > { %v1878_v58 = vadd.f32 %v1877_v30, %v4324_v62  ;;  %v3045_v28 = vpop.f32.mrb[54].mxu1 }
 0x435   : > { %v1880_v39 = vpop.f32.mrb[55].mxu1  ;;  %v1957_v14 = vmax.f32 %v1886_v0, 0.0  ;;  %v1889_v5 = vadd.f32 %v3045_v28, %v4324_v62 }
 0x436   : > { %v1955_v11 = vmax.f32 %v1878_v58, 0.0  ;;  %v1881_v50 = vadd.f32 %v1880_v39, %v4324_v62 }
 0x437   : > { %v1958_v61 = vmax.f32 %v1889_v5, 0.0 }
 0x438   : > { %3079 = vmatmul.mubr.msk.f32.vlgmr.msra.gmra.mrb[82].mxu0 %vm1605_vm2, %v1955_v11  ;;  %v1956_v13 = vmax.f32 %v1881_v50, 0.0 }
 0x439   : > { %3081 = vmatprep.mubr.msk.f32.mxu0 %vm3350_vm0, %v3351_v4 }
 0x43a   : > { %v3048_v1 = vpop.f32.mrb[56].mxu1 }
 0x43b   : > { %v1893_v27 = vpop.f32.mrb[57].mxu1  ;;  %v1902_v47 = vadd.f32 %v3048_v1, %v4324_v62 }
 0x43c   : > { %v3049_v41 = vpop.f32.mrb[58].mxu1  ;;  %3082 = vmatmul.mubr.msk.f32.gmra.mrb[104].mxu0 %vm1605_vm2, %v1956_v13  ;;  %v1894_v49 = vadd.f32 %v1893_v27, %v4324_v62 }
 0x43d   : > { %v1896_v2 = vpop.f32.mrb[59].mxu1  ;;  %3084 = vmatprep.mubr.msk.f32.mxu0 %vm3350_vm0, %v3351_v4  ;;  %v1961_v35 = vmax.f32 %v1902_v47, 0.0  ;;  %v1905_v59 = vadd.f32 %v3049_v41, %v4324_v62 }
 0x43e   : > { %v1959_v26 = vmax.f32 %v1894_v49, 0.0  ;;  %v1897_v45 = vadd.f32 %v1896_v2, %v4324_v62 }
 0x43f   : > { %v1962_v22 = vmax.f32 %v1905_v59, 0.0 }
 0x440   : > { %3085 = vmatmul.mubr.msk.f32.gmra.mrb[106].mxu0 %vm1605_vm2, %v1957_v14  ;;  %v1960_v55 = vmax.f32 %v1897_v45, 0.0 }
 0x441   : > { %3087 = vmatprep.mubr.msk.f32.mxu0 %vm3350_vm0, %v3351_v4 }
 0x442   : > { %v3052_v7 = vpop.f32.mrb[60].mxu1 }
 0x443   : > { %v1909_v25 = vpop.f32.mrb[61].mxu1  ;;  %v1918_v21 = vadd.f32 %v3052_v7, %v4324_v62 }
 0x444   : > { %v3053_v37 = vpop.f32.mrb[62].mxu1  ;;  %3088 = vmatmul.mubr.msk.f32.gmra.mrb[108].mxu0 %vm1605_vm2, %v1958_v61  ;;  %v1910_v63 = vadd.f32 %v1909_v25, %v4324_v62 }
 0x445   : > { %v1912_v52 = vpop.f32.mrb[63].mxu1  ;;  %3090 = vmatprep.mubr.msk.f32.mxu0 %vm3350_vm0, %v3351_v4  ;;  %v1965_v11 = vmax.f32 %v1918_v21, 0.0  ;;  %v1921_v50 = vadd.f32 %v3053_v37, %v4324_v62 }
 0x446   : > { %v1963_v44 = vmax.f32 %v1910_v63, 0.0  ;;  %v1913_v20 = vadd.f32 %v1912_v52, %v4324_v62 }
 0x448   : > { %3091 = vmatmul.mubr.msk.f32.gmra.mrb[110].mxu0 %vm1605_vm2, %v1959_v26  ;;  %v1964_v30 = vmax.f32 %v1913_v20, 0.0 }
 0x449   : > { %3093 = vmatprep.mubr.msk.f32.mxu0 %vm3350_vm0, %v3351_v4 }
 0x44a   : > { %v3056_v51 = vpop.f32.mrb[64].mxu1 }
 0x44b   : > { %v1925_v60 = vpop.f32.mrb[65].mxu1 }
 0x44c   : > { %v3057_v57 = vpop.f32.mrb[66].mxu1  ;;  %3094 = vmatmul.mubr.msk.f32.gmra.mrb[112].mxu0 %vm1605_vm2, %v1960_v55  ;;  %v1926_v27 = vadd.f32 %v1925_v60, %v4324_v62 }
 0x44d   : > { %v1928_v8 = vpop.f32.mrb[67].mxu1  ;;  %3096 = vmatprep.mubr.msk.f32.mxu0 %vm3350_vm0, %v3351_v4  ;;  %v1937_v45 = vadd.f32 %v3057_v57, %v4324_v62 }
 0x44e   : > { %v1929_v5 = vadd.f32 %v1928_v8, %v4324_v62 }
 0x450   : > { %3097 = vmatmul.mubr.msk.f32.gmra.mrb[114].mxu0 %vm1605_vm2, %v1961_v35  ;;  %v1968_v25 = vmax.f32 %v1929_v5, 0.0 }
 0x451   : > { %3099 = vmatprep.mubr.msk.f32.mxu0 %vm3350_vm0, %v3351_v4 }
 0x452   : > { %v3060_v19 = vpop.f32.mrb[68].mxu1 }
 0x453   : > { %v4357_v9 = vadd.f32 %v3060_v19, %v4324_v62  ;;  %v1941_v34 = vpop.f32.mrb[69].mxu1 }
 0x454   : > { %v4360_v12 = vadd.f32 %v1941_v34, %v4324_v62  ;;  %v3061_v38 = vpop.f32.mrb[70].mxu1  ;;  %3100 = vmatmul.mubr.msk.f32.gmra.mrb[116].mxu0 %vm1605_vm2, %v1962_v22 }
 0x455   : > { %v1944_v16 = vpop.f32.mrb[71].mxu1  ;;  %3102 = vmatprep.mubr.msk.f32.mxu0 %vm3350_vm0, %v3351_v4 }
 0x456   : > { %v1945_v24 = vadd.f32 %v1944_v16, %v4324_v62 }
 0x458   : > { %3103 = vmatmul.mubr.msk.f32.gmra.mrb[118].mxu0 %vm1605_vm2, %v1963_v44 }
 0x459   : > { %3105 = vmatprep.mubr.msk.f32.mxu0 %vm3350_vm0, %v3351_v4 }
 0x45a   : > { %v2323_v58 = vpop.f32.mrb[72].mxu1 }
 0x45b   : > { %v4372_v28 = vadd.f32 %v2323_v58, %v4145_v3  ;;  %v3139_v39 = vpop.f32.mrb[73].mxu1  ;;  %v1966_v3 = vmax.f32 %v1921_v50, 0.0 }
 0x45c   : > { %3106 = vmatmul.mubr.msk.f32.gmra.mrb[120].mxu0 %vm1605_vm2, %v1964_v30 }
 0x45d   : > { %3108 = vmatprep.mubr.msk.f32.mxu0 %vm3350_vm0, %v3351_v4 }
 0x45e   : > { %v2328_v0 = vpop.f32.mrb[74].mxu1 }
 0x45f   : > { %v4379_v13 = vadd.f32 %v2328_v0, %v4147_v6  ;;  %v3142_v1 = vpop.f32.mrb[75].mxu1  ;;  %v1967_v6 = vmax.f32 %v1926_v27, 0.0 }
 0x460   : > { %3109 = vmatmul.mubr.msk.f32.gmra.mrb[122].mxu0 %vm1605_vm2, %v1965_v11 }
 0x461   : > { %3111 = vmatprep.mubr.msk.f32.mxu0 %vm3350_vm0, %v3351_v4 }
 0x462   : > { %v2333_v41 = vpop.f32.mrb[76].mxu1 }
 0x463   : > { %v4386_v2 = vadd.f32 %v2333_v41, %v4149_v46  ;;  %v3145_v14 = vpop.f32.mrb[77].mxu1  ;;  %v1934_v46 = vadd.f32 %v3056_v51, %v4324_v62 }
 0x464   : > { %3112 = vmatmul.mubr.msk.f32.gmra.mrb[124].mxu0 %vm1605_vm2, %v1966_v3 }
 0x465   : > { %3114 = vmatprep.mubr.msk.f32.mxu0 %vm3350_vm0, %v3351_v4 }
 0x466   : > { %v2338_v61 = vpop.f32.mrb[78].mxu1 }
 0x467   : > { %v4393_v49 = vadd.f32 %v2338_v61, %v4151_v43  ;;  %v3148_v7 = vpop.f32.mrb[79].mxu1  ;;  %v1969_v43 = vmax.f32 %v1934_v46, 0.0  ;;  %v3340_v61 = vld [vmem:[%s4562_s7] sm:$0xf] }
 0x468   : > { %3115 = vmatmul.mubr.msk.f32.gmra.mrb[126].mxu0 %vm1605_vm2, %v1967_v6 }
 0x469   : > { %3117 = vmatprep.mubr.msk.f32.mxu0 %vm3350_vm0, %v3351_v4 }
 0x46a   : > { %v2343_v37 = vpop.f32.mrb[80].mxu1 }
 0x46b   : > { %v4400_v52 = vadd.f32 %v2343_v37, %v4153_v32  ;;  %v3151_v26 = vpop.f32.mrb[81].mxu1  ;;  %v1970_v32 = vmax.f32 %v1937_v45, 0.0 }
 0x46c   : > { %3118 = vmatmul.mubr.msk.f32.gmra.mrb[128].mxu0 %vm1605_vm2, %v1968_v25 }
 0x46d   : > { %3120 = vmatprep.mubr.msk.f32.mxu0 %vm3350_vm0, %v3351_v4 }
 0x46e   : > { %v2348_v47 = vpop.f32.mrb[82].mxu1 }
 0x46f   : > { %v4407_v55 = vadd.f32 %v2348_v47, %v4155_v53  ;;  %v3154_v60 = vpop.f32.mrb[83].mxu1  ;;  %v1971_v53 = vmax.f32 %v4360_v12, 0.0 }
 0x470   : > { %3121 = vmatmul.mubr.msk.f32.gmra.mrb[130].mxu0 %vm1605_vm2, %v1969_v43 }
 0x471   : > { %3123 = vmatprep.mubr.msk.f32.mxu0 %vm3350_vm0, %v3351_v4 }
 0x472   : > { %v2353_v51 = vpop.f32.mrb[84].mxu1 }
 0x473   : > { %v4413_v8 = vadd.f32 %v2353_v51, %v4157_v48  ;;  %v3157_v35 = vpop.f32.mrb[85].mxu1  ;;  %v1972_v48 = vmax.f32 %v1945_v24, 0.0 }
 0x474   : > { %3124 = vmatmul.mubr.msk.f32.gmra.mrb[132].mxu0 %vm1605_vm2, %v1970_v32 }
 0x475   : > { %3126 = vmatprep.mubr.msk.f32.mxu0 %vm3350_vm0, %v3351_v4 }
 0x476   : > { %v2358_v62 = vpop.f32.mrb[86].mxu1 }
 0x477   : > { %v4420_v57 = vadd.f32 %v2358_v62, %v4159_v54  ;;  %v3160_v59 = vpop.f32.mrb[87].mxu1  ;;  %v1973_v54 = vmax.f32 %v4357_v9, 0.0 }
 0x478   : > { %3127 = vmatmul.mubr.msk.f32.gmra.mrb[134].mxu0 %vm1605_vm2, %v1971_v53 }
 0x479   : > { %3129 = vmatprep.mubr.msk.f32.mxu0 %vm3350_vm0, %v3351_v4 }
 0x47a   : > { %v2363_v22 = vpop.f32.mrb[88].mxu1 }
 0x47b   : > { %v4426_v63 = vadd.f32 %v2363_v22, %v4161_v56  ;;  %v3163_v19 = vpop.f32.mrb[89].mxu1 }
 0x47c   : > { %3130 = vmatmul.mubr.msk.f32.gmra.mrb[136].mxu0 %vm1605_vm2, %v1972_v48 }
 0x47d   : > { %3132 = vmatprep.mubr.msk.f32.mxu0 %vm3350_vm0, %v3351_v4 }
 0x47e   : > { %v2368_v34 = vpop.f32.mrb[90].mxu1 }
 0x47f   : > { %v4433_v12 = vadd.f32 %v2368_v34, %v4163_v15  ;;  %v3166_v38 = vpop.f32.mrb[91].mxu1 }
 0x480   : > { %3133 = vmatmul.mubr.msk.f32.gmra.mrb[138].mxu0 %vm1605_vm2, %v1973_v54 }
 0x482   : > { %v2373_v16 = vpop.f32.mrb[92].mxu1 }
 0x483   : > { %v4437_v44 = vadd.f32 %v2373_v16, %v4165_v17  ;;  %v3169_v56 = vpop.f32.mrb[93].mxu1 }
 0x486   : > { %v2378_v20 = vpop.f32.mrb[94].mxu1 }
 0x487   : > { %v4440_v24 = vadd.f32 %v2378_v20, %v4167_v23  ;;  %v3172_v21 = vpop.f32.mrb[95].mxu1 }
 0x48a   : > { %v2383_v4 = vpop.f32.mrb[96].mxu1 }
 0x48b   : > { %v4443_v9 = vadd.f32 %v2383_v4, %v4169_v29  ;;  %v3175_v30 = vpop.f32.mrb[97].mxu1 }
 0x48e   : > { %v2388_v15 = vpop.f32.mrb[98].mxu1 }
 0x48f   : > { %v4446_v58 = vadd.f32 %v2388_v15, %v4171_v31  ;;  %v3178_v39 = vpop.f32.mrb[99].mxu1 }
 0x492   : > { %v2393_v11 = vpop.f32.mrb[100].mxu1 }
 0x493   : > { %v4449_v17 = vadd.f32 %v2393_v11, %v4173_v33  ;;  %v3181_v50 = vpop.f32.mrb[101].mxu1 }
 0x496   : > { %v2398_v0 = vpop.f32.mrb[102].mxu1 }
 0x497   : > { %v4452_v23 = vadd.f32 %v2398_v0, %v4175_v42  ;;  %v3184_v1 = vpop.f32.mrb[103].mxu1  ;;  %v2438_v42 = vsub.s32 3, %v3871_v18 }
 0x499   : > { %v4467_v7 = vrot.slane %v3340_v61, %v2438_v42 }
 0x49a   : > { %v2403_v3 = vpop.f32.mrb[104].mxu1 }
 0x49b   : > { %v4455_v29 = vadd.f32 %v2403_v3, %v4177_v36  ;;  %v3187_v27 = vpop.f32.mrb[105].mxu1 }
 0x49e   : > { %v2408_v41 = vpop.f32.mrb[106].mxu1 }
 0x49f   : > { %v4458_v31 = vadd.f32 %v2408_v41, %v4179_v40  ;;  %v3190_v14 = vpop.f32.mrb[107].mxu1 }
 0x4a2   : > { %v2413_v6 = vpop.f32.mrb[108].mxu1 }
 0x4a3   : > { %v4461_v33 = vadd.f32 %v2413_v6, %v4191_v10  ;;  %v3193_v5 = vpop.f32.mrb[109].mxu1 }
 0x50b   : > { %v2105_v36 = vpop.f32.mrb[82].mxu0 }
 0x50c   : > { %v2417_v46 = vadd.f32 %v4372_v28, %v2105_v36  ;;  %v3080_v25 = vpop.f32.mrb[83].mxu0 }
 0x50e   : > { %v2440_v18 = vadd.f32 %v4467_v7, %v2417_v46 }
 0x50f   : > { %v2110_v40 = vpop.f32.mrb[104].mxu0 }
 0x510   : > { %2460 = vst.msk [vmem:[%s4475_s19] sm:$0xff] %vm2459_vm4, %v2440_v18  ;;  %v2418_v10 = vadd.f32 %v4379_v13, %v2110_v40  ;;  %v3083_v28 = vpop.f32.mrb[105].mxu0 }
 0x512   : > { %v2441_v37 = vadd.f32 %v4467_v7, %v2418_v10 }
 0x513   : > { %v2115_v26 = vpop.f32.mrb[106].mxu0 }
 0x514   : > { %2461 = vst.msk [vmem:[%s4475_s19 + $0x8] sm:$0xff] %vm2459_vm4, %v2441_v37  ;;  %v2419_v43 = vadd.f32 %v4386_v2, %v2115_v26  ;;  %v3086_v45 = vpop.f32.mrb[107].mxu0 }
 0x516   : > { %v2442_v47 = vadd.f32 %v4467_v7, %v2419_v43 }
 0x517   : > { %v2120_v60 = vpop.f32.mrb[108].mxu0 }
 0x518   : > { %2462 = vst.msk [vmem:[%s4475_s19 + $0x10] sm:$0xff] %vm2459_vm4, %v2442_v47  ;;  %v2420_v32 = vadd.f32 %v4393_v49, %v2120_v60  ;;  %v3089_v51 = vpop.f32.mrb[109].mxu0 }
 0x51a   : > { %v2443_v13 = vadd.f32 %v4467_v7, %v2420_v32 }
 0x51b   : > { %v2125_v35 = vpop.f32.mrb[110].mxu0 }
 0x51c   : > { %2463 = vst.msk [vmem:[%s4475_s19 + $0x18] sm:$0xff] %vm2459_vm4, %v2443_v13  ;;  %v2421_v53 = vadd.f32 %v4400_v52, %v2125_v35  ;;  %v3092_v62 = vpop.f32.mrb[111].mxu0 }
 0x51e   : > { %v2444_v2 = vadd.f32 %v4467_v7, %v2421_v53 }
 0x51f   : > { %v2130_v59 = vpop.f32.mrb[112].mxu0 }
 0x520   : > { %2464 = vst.msk [vmem:[%s4475_s19 + $0x20] sm:$0xff] %vm2459_vm4, %v2444_v2  ;;  %v2422_v48 = vadd.f32 %v4407_v55, %v2130_v59  ;;  %v3095_v22 = vpop.f32.mrb[113].mxu0 }
 0x522   : > { %v2445_v49 = vadd.f32 %v4467_v7, %v2422_v48 }
 0x523   : > { %v2135_v19 = vpop.f32.mrb[114].mxu0 }
 0x524   : > { %2465 = vst.msk [vmem:[%s4475_s19 + $0x28] sm:$0xff] %vm2459_vm4, %v2445_v49  ;;  %v2423_v54 = vadd.f32 %v4413_v8, %v2135_v19  ;;  %v3098_v34 = vpop.f32.mrb[115].mxu0 }
 0x526   : > { %v2446_v52 = vadd.f32 %v4467_v7, %v2423_v54 }
 0x527   : > { %v2140_v38 = vpop.f32.mrb[116].mxu0 }
 0x528   : > { %2466 = vst.msk [vmem:[%s4475_s19 + $0x30] sm:$0xff] %vm2459_vm4, %v2446_v52  ;;  %v2424_v16 = vadd.f32 %v4420_v57, %v2140_v38  ;;  %v3101_v56 = vpop.f32.mrb[117].mxu0 }
 0x52a   : > { %v2447_v55 = vadd.f32 %v4467_v7, %v2424_v16 }
 0x52b   : > { %v2145_v20 = vpop.f32.mrb[118].mxu0 }
 0x52c   : > { %2467 = vst.msk [vmem:[%s4475_s19 + $0x38] sm:$0xff] %vm2459_vm4, %v2447_v55  ;;  %v2425_v21 = vadd.f32 %v4426_v63, %v2145_v20  ;;  %v3104_v4 = vpop.f32.mrb[119].mxu0 }
 0x52e   : > { %v2448_v8 = vadd.f32 %v4467_v7, %v2425_v21 }
 0x52f   : > { %v2150_v30 = vpop.f32.mrb[120].mxu0 }
 0x530   : > { %2468 = vst.msk [vmem:[%s4475_s19 + $0x40] sm:$0xff] %vm2459_vm4, %v2448_v8  ;;  %v2426_v15 = vadd.f32 %v4433_v12, %v2150_v30  ;;  %v3107_v39 = vpop.f32.mrb[121].mxu0 }
 0x532   : > { %v2449_v57 = vadd.f32 %v4467_v7, %v2426_v15 }
 0x533   : > { %v2155_v11 = vpop.f32.mrb[122].mxu0 }
 0x534   : > { %2469 = vst.msk [vmem:[%s4475_s19 + $0x48] sm:$0xff] %vm2459_vm4, %v2449_v57  ;;  %v2427_v50 = vadd.f32 %v4437_v44, %v2155_v11  ;;  %v3110_v0 = vpop.f32.mrb[123].mxu0 }
 0x536   : > { %v2450_v63 = vadd.f32 %v4467_v7, %v2427_v50 }
 0x537   : > { %v2160_v1 = vpop.f32.mrb[124].mxu0 }
 0x538   : > { %2470 = vst.msk [vmem:[%s4475_s19 + $0x50] sm:$0xff] %vm2459_vm4, %v2450_v63  ;;  %v2428_v3 = vadd.f32 %v4440_v24, %v2160_v1  ;;  %v3113_v27 = vpop.f32.mrb[125].mxu0 }
 0x53a   : > { %v2451_v12 = vadd.f32 %v4467_v7, %v2428_v3 }
 0x53b   : > { %v2165_v41 = vpop.f32.mrb[126].mxu0 }
 0x53c   : > { %2471 = vst.msk [vmem:[%s4475_s19 + $0x58] sm:$0xff] %vm2459_vm4, %v2451_v12  ;;  %v2429_v14 = vadd.f32 %v4443_v9, %v2165_v41  ;;  %v3116_v6 = vpop.f32.mrb[127].mxu0 }
 0x53e   : > { %v2452_v44 = vadd.f32 %v4467_v7, %v2429_v14 }
 0x53f   : > { %v2170_v5 = vpop.f32.mrb[128].mxu0 }
 0x540   : > { %2472 = vst.msk [vmem:[%s4475_s19 + $0x60] sm:$0xff] %vm2459_vm4, %v2452_v44  ;;  %v2430_v42 = vadd.f32 %v4446_v58, %v2170_v5  ;;  %v3119_v61 = vpop.f32.mrb[129].mxu0 }
 0x542   : > { %v2453_v24 = vadd.f32 %v4467_v7, %v2430_v42 }
 0x543   : > { %v2175_v36 = vpop.f32.mrb[130].mxu0 }
 0x544   : > { %2473 = vst.msk [vmem:[%s4475_s19 + $0x68] sm:$0xff] %vm2459_vm4, %v2453_v24  ;;  %v2431_v46 = vadd.f32 %v4449_v17, %v2175_v36  ;;  %v3122_v25 = vpop.f32.mrb[131].mxu0 }
 0x546   : > { %v2454_v9 = vadd.f32 %v4467_v7, %v2431_v46 }
 0x547   : > { %v2180_v18 = vpop.f32.mrb[132].mxu0 }
 0x548   : > { %2474 = vst.msk [vmem:[%s4475_s19 + $0x70] sm:$0xff] %vm2459_vm4, %v2454_v9  ;;  %v2432_v40 = vadd.f32 %v4452_v23, %v2180_v18  ;;  %v3125_v10 = vpop.f32.mrb[133].mxu0 }
 0x54a   : > { %v2455_v58 = vadd.f32 %v4467_v7, %v2432_v40 }
 0x54b   : > { %v2185_v28 = vpop.f32.mrb[134].mxu0 }
 0x54c   : > { %2475 = vst.msk [vmem:[%s4475_s19 + $0x78] sm:$0xff] %vm2459_vm4, %v2455_v58  ;;  %v2433_v37 = vadd.f32 %v4455_v29, %v2185_v28  ;;  %v3128_v26 = vpop.f32.mrb[135].mxu0 }
 0x54e   : > { %v2456_v17 = vadd.f32 %v4467_v7, %v2433_v37 }
 0x54f   : > { %v2190_v43 = vpop.f32.mrb[136].mxu0 }
 0x550   : > { %2476 = vst.msk [vmem:[%s4475_s19 + $0x80] sm:$0xff] %vm2459_vm4, %v2456_v17  ;;  %v2434_v45 = vadd.f32 %v4458_v31, %v2190_v43  ;;  %v3131_v47 = vpop.f32.mrb[137].mxu0 }
 0x552   : > { %v2457_v23 = vadd.f32 %v4467_v7, %v2434_v45 }
 0x553   : > { %v2195_v60 = vpop.f32.mrb[138].mxu0 }
 0x554   : > { %2477 = vst.msk [vmem:[%s4475_s19 + $0x88] sm:$0xff] %vm2459_vm4, %v2457_v23  ;;  %v2435_v32 = vadd.f32 %v4461_v33, %v2195_v60  ;;  %v3134_v51 = vpop.f32.mrb[139].mxu0 }
 0x556   : > { %v2458_v13 = vadd.f32 %v4467_v7, %v2435_v32 }
 0x558   : > { %2478 = vst.msk [vmem:[%s4475_s19 + $0x90] sm:$0xff] %vm2459_vm4, %v2458_v13 }
 0x559 PF: > { %s21_s17 = sadd.s32 1, %s3347_s17  }
 0x55a   : > { %p18_p4 = scmp.ge.s32.totalorder %s21_s17, 4  }
 0x55c   :  { %20 = sbr.rel (!%p18_p4) target bundleno = 1 (0x1), region = 97 }

</bundles_post_ra>
